<compile_context>
chip_gen: v7x
topology: tpu7x:2x2x1
jax: 0.10.0
libtpu: 0.0.40
codegen_flags: <defaults>
</compile_context>

<pallas_src>
import functools
import math

import jax
import jax.numpy as jnp
from jax.experimental import pallas as pl
from jax.experimental.pallas import tpu as pltpu


def _layer_norm(v, w, b, eps):
    # v: (M, C), w/b: (1, C); normalize over the channel axis, f32 math, rsqrt on EUP.
    u = jnp.mean(v, axis=-1, keepdims=True)
    vc = v - u
    var = jnp.mean(vc * vc, axis=-1, keepdims=True)
    return w * (vc * jax.lax.rsqrt(var + eps)) + b


def _gelu_tanh(x):
    # tanh-approx GELU (max ~1e-3 abs vs exact erf GELU); one EUP tanh + a few VALU muls.
    # TODO(synk): swap back to exact-erf GELU if bit-level parity with nn.GELU() is needed.
    c = math.sqrt(2.0 / math.pi)
    return 0.5 * x * (1.0 + jnp.tanh(c * (x + 0.044715 * (x * x * x))))


def self_attention_kernel(x_ref, w_ref, vec_ref, o_ref, *, num_heads, seq_len, eps):
    """One grid step processes `b_blk` batch elements, token-major.

    x_ref  : (b_blk*S, C)  activations, lane-dense (C on lanes)
    w_ref  : (C, 6C) bf16  packed weights [Wqkv (3C) | Wo (C) | W1 (C) | W2 (C)]
    vec_ref: (10, C) f32   rows = [ln1_w, ln1_b, bq, bk, bv, bo, ln2_w, ln2_b, b1, b2]
    o_ref  : (b_blk*S, C)
    """
    x = x_ref[...].astype(jnp.float32)                      # (M, C)
    M, C = x.shape
    S = seq_len
    n_b = M // S
    Dh = C // num_heads
    scale = 1.0 / math.sqrt(Dh)

    ln1w, ln1b = vec_ref[0:1, :], vec_ref[1:2, :]
    b_q, b_k, b_v = vec_ref[2:3, :], vec_ref[3:4, :], vec_ref[4:5, :]
    b_o = vec_ref[5:6, :]
    ln2w, ln2b = vec_ref[6:7, :], vec_ref[7:8, :]
    b_1, b_2 = vec_ref[8:9, :], vec_ref[9:10, :]

    w_qkv = w_ref[:, 0 * C:3 * C]                           # (C, 3C) bf16
    w_o = w_ref[:, 3 * C:4 * C]                             # (C, C)  bf16
    w_1 = w_ref[:, 4 * C:5 * C]
    w_2 = w_ref[:, 5 * C:6 * C]

    # --- self.ln ---
    x_ln = _layer_norm(x, ln1w, ln1b, eps)

    # --- fused QKV: one lane-packed N=3C matmul (bf16 operands, f32 accumulation) ---
    qkv = jnp.dot(x_ln.astype(jnp.bfloat16), w_qkv,
                  preferred_element_type=jnp.float32)       # (M, 3C)
    q = qkv[:, 0 * C:1 * C] + b_q
    k = qkv[:, 1 * C:2 * C] + b_k
    v = qkv[:, 2 * C:3 * C] + b_v

    # --- per-(batch, head) scaled-dot-product attention (small extents: fully unrolled) ---
    ctx_blocks = []
    for b in range(n_b):
        r0, r1 = b * S, (b + 1) * S
        head_outs = []
        for h in range(num_heads):
            c0, c1 = h * Dh, (h + 1) * Dh
            qh = q[r0:r1, c0:c1].astype(jnp.bfloat16)
            kh = k[r0:r1, c0:c1].astype(jnp.bfloat16)
            vh = v[r0:r1, c0:c1].astype(jnp.bfloat16)
            # scores = q @ k^T (contract last dims; no materialized transpose)
            s = jax.lax.dot_general(qh, kh, (((1,), (1,)), ((), ())),
                                    preferred_element_type=jnp.float32) * scale   # (S, S)
            s = s - jnp.max(s, axis=-1, keepdims=True)
            p = jnp.exp(s)
            p = p * pl.reciprocal(jnp.sum(p, axis=-1, keepdims=True), approx=True)
            head_outs.append(jnp.dot(p.astype(jnp.bfloat16), vh,
                                     preferred_element_type=jnp.float32))          # (S, Dh)
        # concat heads -> (S, C): one full-depth (K=C) out-projection below
        ctx_blocks.append(jnp.concatenate(head_outs, axis=-1))
    ctx = ctx_blocks[0] if n_b == 1 else jnp.concatenate(ctx_blocks, axis=0)       # (M, C)

    attn = jnp.dot(ctx.astype(jnp.bfloat16), w_o,
                   preferred_element_type=jnp.float32) + b_o

    # --- residual 1 ---
    y = attn + x

    # --- ff_self: LayerNorm -> Linear -> GELU -> Linear, + residual 2 ---
    y_ln = _layer_norm(y, ln2w, ln2b, eps)
    h1 = _gelu_tanh(jnp.dot(y_ln.astype(jnp.bfloat16), w_1,
                            preferred_element_type=jnp.float32) + b_1)
    ff = jnp.dot(h1.astype(jnp.bfloat16), w_2,
                 preferred_element_type=jnp.float32) + b_2

    o_ref[...] = (ff + y).astype(o_ref.dtype)               # lane-dense, unmasked store


def _pick_batch_block(batch, seq, max_rows=512):
    """Largest divisor of `batch` such that b_blk*seq <= max_rows rows per step, while
    keeping >= 2 parallel grid steps whenever batch >= 2 (v7x has two TensorCores)."""
    best = 1
    for cand in range(1, batch + 1):
        if batch % cand:
            continue
        if cand * seq > max_rows:
            continue
        if batch >= 2 and (batch // cand) < 2:
            continue
        best = cand
    return best


def self_attention_forward(x, params, *, num_heads=2, eps=1e-5, interpret=False):
    """x: (B, C, size, size); params in math convention (y = x @ W + b)."""
    B, C, Hs, Ws = x.shape
    S = Hs * Ws
    assert C % num_heads == 0

    # Token-major, lane-dense layout: the module's swapaxes(1, 2) is one small XLA
    # transpose here instead of an XLU transpose on every grid step's critical path.
    x_rows = x.reshape(B, C, S).transpose(0, 2, 1).reshape(B * S, C)

    # Pack the four weight matrices into one bf16 slab: [Wqkv | Wo | W1 | W2] -> (C, 6C).
    w_qkv = jnp.concatenate([params["wq"], params["wk"], params["wv"]], axis=1)
    w_slab = jnp.concatenate([w_qkv, params["wo"], params["w1"], params["w2"]],
                             axis=1).astype(jnp.bfloat16)

    # Pack every per-channel vector into one small f32 slab (row order documented in kernel).
    vec_slab = jnp.stack([params["ln1_w"], params["ln1_b"],
                          params["bq"], params["bk"], params["bv"],
                          params["bo"],
                          params["ln2_w"], params["ln2_b"],
                          params["b1"], params["b2"]], axis=0).astype(jnp.float32)

    b_blk = _pick_batch_block(B, S)
    rows = b_blk * S
    grid = (B // b_blk,)

    kernel = functools.partial(self_attention_kernel, num_heads=num_heads,
                               seq_len=S, eps=eps)

    # TODO(synk): for long sequences the per-head f32 (S, S) score tile stops fitting the
    # scoped VMEM budget — raise vmem_limit_bytes and switch to flash-style KV tiling around
    # S~2048 on v7x (64 MiB VMEM) / S~4096 on v5e & v6e; v5e's 16 MiB scoped default trips first.
    out = pl.pallas_call(
        kernel,
        out_shape=jax.ShapeDtypeStruct((B * S, C), x.dtype),
        grid_spec=pltpu.PrefetchScalarGridSpec(
            num_scalar_prefetch=0,
            grid=grid,
            in_specs=[
                pl.BlockSpec((rows, C), lambda i: (i, 0)),
                pl.BlockSpec((C, 6 * C), lambda i: (0, 0)),
                pl.BlockSpec((10, C), lambda i: (0, 0)),
            ],
            out_specs=pl.BlockSpec((rows, C), lambda i: (i, 0)),
        ),
        compiler_params=pltpu.CompilerParams(
            dimension_semantics=("parallel",)),   # batch-block axis -> 2 TCs on v7x
        interpret=interpret,
    )(x_rows, w_slab, vec_slab)

    return out.reshape(B, S, C).transpose(0, 2, 1).reshape(B, C, Hs, Ws)


if __name__ == "__main__":
    B, C, size = 2, 128, 8          # lane-dense channel dim; S = 64 tokens
    num_heads = 2
    Dh = C // num_heads
    S = size * size

    key = jax.random.PRNGKey(0)
    keys = jax.random.split(key, 17)

    def rnd(k, shape, scale):
        return (scale * jax.random.normal(k, shape)).astype(jnp.float32)

    params = dict(
        ln1_w=1.0 + rnd(keys[0], (C,), 0.1), ln1_b=rnd(keys[1], (C,), 0.2),
        wq=rnd(keys[2], (C, C), 0.1), wk=rnd(keys[3], (C, C), 0.1),
        wv=rnd(keys[4], (C, C), 0.1),
        bq=rnd(keys[5], (C,), 0.2), bk=rnd(keys[6], (C,), 0.2), bv=rnd(keys[7], (C,), 0.2),
        wo=rnd(keys[8], (C, C), 0.1), bo=rnd(keys[9], (C,), 0.2),
        ln2_w=1.0 + rnd(keys[10], (C,), 0.1), ln2_b=rnd(keys[11], (C,), 0.2),
        w1=rnd(keys[12], (C, C), 0.1), b1=rnd(keys[13], (C,), 0.2),
        w2=rnd(keys[14], (C, C), 0.1), b2=rnd(keys[15], (C,), 0.2),
    )
    x = jax.random.normal(keys[16], (B, C, size, size), dtype=jnp.float32)

    y = self_attention_forward(x, params, num_heads=num_heads)
    y = jax.block_until_ready(y)

    # ---- plain-JAX f32 reference mirroring the PyTorch forward exactly ----
    def ref_forward(xi, p):
        hp = jax.lax.Precision.HIGHEST
        xr = xi.reshape(B, C, S).swapaxes(1, 2)                      # (B, S, C)

        def ln(v, w, b, eps=1e-5):
            u = v.mean(-1, keepdims=True)
            var = ((v - u) ** 2).mean(-1, keepdims=True)
            return w * (v - u) / jnp.sqrt(var + eps) + b

        x_ln = ln(xr, p["ln1_w"], p["ln1_b"])
        q = jnp.einsum("bsc,cd->bsd", x_ln, p["wq"], precision=hp) + p["bq"]
        k = jnp.einsum("bsc,cd->bsd", x_ln, p["wk"], precision=hp) + p["bk"]
        v = jnp.einsum("bsc,cd->bsd", x_ln, p["wv"], precision=hp) + p["bv"]
        qh = q.reshape(B, S, num_heads, Dh).transpose(0, 2, 1, 3)
        kh = k.reshape(B, S, num_heads, Dh).transpose(0, 2, 1, 3)
        vh = v.reshape(B, S, num_heads, Dh).transpose(0, 2, 1, 3)
        sc = jnp.einsum("bhqd,bhkd->bhqk", qh, kh, precision=hp) / math.sqrt(Dh)
        a = jax.nn.softmax(sc, axis=-1)
        oh = jnp.einsum("bhqk,bhkd->bhqd", a, vh, precision=hp)
        o = oh.transpose(0, 2, 1, 3).reshape(B, S, C)
        attn = jnp.einsum("bsc,cd->bsd", o, p["wo"], precision=hp) + p["bo"]
        yv = attn + xr
        y_ln = ln(yv, p["ln2_w"], p["ln2_b"])
        h1 = jax.nn.gelu(
            jnp.einsum("bsc,cd->bsd", y_ln, p["w1"], precision=hp) + p["b1"],
            approximate=False)
        ff = jnp.einsum("bsc,cd->bsd", h1, p["w2"], precision=hp) + p["b2"]
        return (ff + yv).swapaxes(1, 2).reshape(B, C, size, size)

    ref = ref_forward(x, params)
    max_err = float(jnp.max(jnp.abs(y - ref)))
    # Tolerance reflects bf16 matmul operands + tanh-GELU (f32 reference is exact-erf, f32).
    assert jnp.allclose(y, ref, atol=5e-2, rtol=5e-2), (
        f"mismatch vs reference, max abs err={max_err}")
    print("KERNEL_OK")
</pallas_src>

<mosaic_0001>
module attributes {stable_mosaic.version = 11 : i64} {
  func.func @self_attention_kernel(%arg0: i32, %arg1: memref<64x128xf32, #tpu.memory_space<vmem>>, %arg2: memref<128x768xbf16, #tpu.memory_space<vmem>>, %arg3: memref<10x128xf32, #tpu.memory_space<vmem>>, %arg4: memref<64x128xf32, #tpu.memory_space<vmem>>) attributes {dimension_semantics = [#tpu.dimension_semantics<parallel>], iteration_bounds = array<i64: 2>, scalar_prefetch = 0 : i64, scratch_operands = 0 : i64, tpu.core_type = #tpu.core_type<tc>, window_params = [{transform_indices = @transform_0, window_bounds = array<i64: 64, 128>}, {pipeline_mode = #tpu.pipeline_mode<synchronous>, transform_indices = @transform_1, window_bounds = array<i64: 128, 768>}, {pipeline_mode = #tpu.pipeline_mode<synchronous>, transform_indices = @transform_2, window_bounds = array<i64: 10, 128>}, {transform_indices = @transform_3, window_bounds = array<i64: 64, 128>}]} {
    %c0 = arith.constant 0 : index
    %c0_0 = arith.constant 0 : index
    %0 = vector.load %arg1[%c0, %c0_0] : memref<64x128xf32, #tpu.memory_space<vmem>>, vector<64x128xf32>
    %c0_1 = arith.constant 0 : index
    %c0_2 = arith.constant 0 : index
    %1 = vector.load %arg3[%c0_1, %c0_2] : memref<10x128xf32, #tpu.memory_space<vmem>>, vector<1x128xf32>
    %c1 = arith.constant 1 : index
    %c0_3 = arith.constant 0 : index
    %2 = vector.load %arg3[%c1, %c0_3] : memref<10x128xf32, #tpu.memory_space<vmem>>, vector<1x128xf32>
    %c2 = arith.constant 2 : index
    %c0_4 = arith.constant 0 : index
    %3 = vector.load %arg3[%c2, %c0_4] : memref<10x128xf32, #tpu.memory_space<vmem>>, vector<1x128xf32>
    %c3 = arith.constant 3 : index
    %c0_5 = arith.constant 0 : index
    %4 = vector.load %arg3[%c3, %c0_5] : memref<10x128xf32, #tpu.memory_space<vmem>>, vector<1x128xf32>
    %c4 = arith.constant 4 : index
    %c0_6 = arith.constant 0 : index
    %5 = vector.load %arg3[%c4, %c0_6] : memref<10x128xf32, #tpu.memory_space<vmem>>, vector<1x128xf32>
    %c5 = arith.constant 5 : index
    %c0_7 = arith.constant 0 : index
    %6 = vector.load %arg3[%c5, %c0_7] : memref<10x128xf32, #tpu.memory_space<vmem>>, vector<1x128xf32>
    %c6 = arith.constant 6 : index
    %c0_8 = arith.constant 0 : index
    %7 = vector.load %arg3[%c6, %c0_8] : memref<10x128xf32, #tpu.memory_space<vmem>>, vector<1x128xf32>
    %c7 = arith.constant 7 : index
    %c0_9 = arith.constant 0 : index
    %8 = vector.load %arg3[%c7, %c0_9] : memref<10x128xf32, #tpu.memory_space<vmem>>, vector<1x128xf32>
    %c8 = arith.constant 8 : index
    %c0_10 = arith.constant 0 : index
    %9 = vector.load %arg3[%c8, %c0_10] : memref<10x128xf32, #tpu.memory_space<vmem>>, vector<1x128xf32>
    %c9 = arith.constant 9 : index
    %c0_11 = arith.constant 0 : index
    %10 = vector.load %arg3[%c9, %c0_11] : memref<10x128xf32, #tpu.memory_space<vmem>>, vector<1x128xf32>
    %c0_12 = arith.constant 0 : index
    %c0_13 = arith.constant 0 : index
    %11 = vector.load %arg2[%c0_12, %c0_13] : memref<128x768xbf16, #tpu.memory_space<vmem>>, vector<128x384xbf16>
    %c0_14 = arith.constant 0 : index
    %c384 = arith.constant 384 : index
    %12 = vector.load %arg2[%c0_14, %c384] : memref<128x768xbf16, #tpu.memory_space<vmem>>, vector<128x128xbf16>
    %c0_15 = arith.constant 0 : index
    %c512 = arith.constant 512 : index
    %13 = vector.load %arg2[%c0_15, %c512] : memref<128x768xbf16, #tpu.memory_space<vmem>>, vector<128x128xbf16>
    %c0_16 = arith.constant 0 : index
    %c640 = arith.constant 640 : index
    %14 = vector.load %arg2[%c0_16, %c640] : memref<128x768xbf16, #tpu.memory_space<vmem>>, vector<128x128xbf16>
    %cst = arith.constant dense<0.000000e+00> : vector<64xf32>
    %15 = vector.multi_reduction <add>, %0, %cst [1] : vector<64x128xf32> to vector<64xf32>
    %16 = vector.shape_cast %15 : vector<64xf32> to vector<64x1xf32>
    %cst_17 = arith.constant 1.280000e+02 : f32
    %17 = vector.broadcast %cst_17 : f32 to vector<64x1xf32>
    %18 = arith.divf %16, %17 : vector<64x1xf32>
    %19 = vector.broadcast %18 : vector<64x1xf32> to vector<64x128xf32>
    %20 = arith.subf %0, %19 : vector<64x128xf32>
    %21 = arith.mulf %20, %20 : vector<64x128xf32>
    %cst_18 = arith.constant dense<0.000000e+00> : vector<64xf32>
    %22 = vector.multi_reduction <add>, %21, %cst_18 [1] : vector<64x128xf32> to vector<64xf32>
    %23 = vector.shape_cast %22 : vector<64xf32> to vector<64x1xf32>
    %cst_19 = arith.constant 1.280000e+02 : f32
    %24 = vector.broadcast %cst_19 : f32 to vector<64x1xf32>
    %25 = arith.divf %23, %24 : vector<64x1xf32>
    %cst_20 = arith.constant 9.99999974E-6 : f32
    %26 = vector.broadcast %cst_20 : f32 to vector<64x1xf32>
    %27 = arith.addf %25, %26 : vector<64x1xf32>
    %28 = math.rsqrt %27 : vector<64x1xf32>
    %29 = vector.broadcast %28 : vector<64x1xf32> to vector<64x128xf32>
    %30 = arith.mulf %20, %29 : vector<64x128xf32>
    %31 = vector.broadcast %1 : vector<1x128xf32> to vector<64x128xf32>
    %32 = arith.mulf %31, %30 : vector<64x128xf32>
    %33 = vector.broadcast %2 : vector<1x128xf32> to vector<64x128xf32>
    %34 = arith.addf %32, %33 : vector<64x128xf32>
    %35 = arith.truncf %34 : vector<64x128xf32> to vector<64x128xbf16>
    %cst_21 = arith.constant dense<0.000000e+00> : vector<64x384xf32>
    %36 = tpu.matmul %35, %11, %cst_21 {dimension_numbers = #tpu.dot_dimension_numbers<[1], [0], [0], [1], [0, 0, 1, 1], [], []>} : vector<64x128xbf16>, vector<128x384xbf16>, vector<64x384xf32> -> vector<64x384xf32>
    %37 = vector.extract_strided_slice %36 {offsets = [0, 0], sizes = [64, 128], strides = [1, 1]} : vector<64x384xf32> to vector<64x128xf32>
    %38 = vector.broadcast %3 : vector<1x128xf32> to vector<64x128xf32>
    %39 = arith.addf %37, %38 : vector<64x128xf32>
    %40 = vector.extract_strided_slice %36 {offsets = [0, 128], sizes = [64, 128], strides = [1, 1]} : vector<64x384xf32> to vector<64x128xf32>
    %41 = vector.broadcast %4 : vector<1x128xf32> to vector<64x128xf32>
    %42 = arith.addf %40, %41 : vector<64x128xf32>
    %43 = vector.extract_strided_slice %36 {offsets = [0, 256], sizes = [64, 128], strides = [1, 1]} : vector<64x384xf32> to vector<64x128xf32>
    %44 = vector.broadcast %5 : vector<1x128xf32> to vector<64x128xf32>
    %45 = arith.addf %43, %44 : vector<64x128xf32>
    %46 = vector.extract_strided_slice %39 {offsets = [0, 0], sizes = [64, 64], strides = [1, 1]} : vector<64x128xf32> to vector<64x64xf32>
    %47 = arith.truncf %46 : vector<64x64xf32> to vector<64x64xbf16>
    %48 = vector.extract_strided_slice %42 {offsets = [0, 0], sizes = [64, 64], strides = [1, 1]} : vector<64x128xf32> to vector<64x64xf32>
    %49 = arith.truncf %48 : vector<64x64xf32> to vector<64x64xbf16>
    %50 = vector.extract_strided_slice %45 {offsets = [0, 0], sizes = [64, 64], strides = [1, 1]} : vector<64x128xf32> to vector<64x64xf32>
    %51 = arith.truncf %50 : vector<64x64xf32> to vector<64x64xbf16>
    %cst_22 = arith.constant dense<0.000000e+00> : vector<64x64xf32>
    %52 = tpu.matmul %47, %49, %cst_22 {dimension_numbers = #tpu.dot_dimension_numbers<[1], [1], [0], [0], [0, 0, 1, 0], [], []>} : vector<64x64xbf16>, vector<64x64xbf16>, vector<64x64xf32> -> vector<64x64xf32>
    %cst_23 = arith.constant 1.250000e-01 : f32
    %53 = vector.broadcast %cst_23 : f32 to vector<64x64xf32>
    %54 = arith.mulf %52, %53 : vector<64x64xf32>
    %cst_24 = arith.constant dense<0xFF800000> : vector<64xf32>
    %55 = vector.multi_reduction <maximumf>, %54, %cst_24 [1] : vector<64x64xf32> to vector<64xf32>
    %56 = vector.shape_cast %55 : vector<64xf32> to vector<64x1xf32>
    %57 = vector.broadcast %56 : vector<64x1xf32> to vector<64x64xf32>
    %58 = arith.subf %54, %57 : vector<64x64xf32>
    %59 = math.exp %58 : vector<64x64xf32>
    %cst_25 = arith.constant dense<0.000000e+00> : vector<64xf32>
    %60 = vector.multi_reduction <add>, %59, %cst_25 [1] : vector<64x64xf32> to vector<64xf32>
    %61 = vector.shape_cast %60 : vector<64xf32> to vector<64x1xf32>
    %62 = tpu.reciprocal %61 {approx = true} : vector<64x1xf32> -> vector<64x1xf32>
    %63 = vector.broadcast %62 : vector<64x1xf32> to vector<64x64xf32>
    %64 = arith.mulf %59, %63 : vector<64x64xf32>
    %65 = arith.truncf %64 : vector<64x64xf32> to vector<64x64xbf16>
    %cst_26 = arith.constant dense<0.000000e+00> : vector<64x64xf32>
    %66 = tpu.matmul %65, %51, %cst_26 {dimension_numbers = #tpu.dot_dimension_numbers<[1], [0], [0], [1], [0, 0, 1, 1], [], []>} : vector<64x64xbf16>, vector<64x64xbf16>, vector<64x64xf32> -> vector<64x64xf32>
    %67 = vector.extract_strided_slice %39 {offsets = [0, 64], sizes = [64, 64], strides = [1, 1]} : vector<64x128xf32> to vector<64x64xf32>
    %68 = arith.truncf %67 : vector<64x64xf32> to vector<64x64xbf16>
    %69 = vector.extract_strided_slice %42 {offsets = [0, 64], sizes = [64, 64], strides = [1, 1]} : vector<64x128xf32> to vector<64x64xf32>
    %70 = arith.truncf %69 : vector<64x64xf32> to vector<64x64xbf16>
    %71 = vector.extract_strided_slice %45 {offsets = [0, 64], sizes = [64, 64], strides = [1, 1]} : vector<64x128xf32> to vector<64x64xf32>
    %72 = arith.truncf %71 : vector<64x64xf32> to vector<64x64xbf16>
    %cst_27 = arith.constant dense<0.000000e+00> : vector<64x64xf32>
    %73 = tpu.matmul %68, %70, %cst_27 {dimension_numbers = #tpu.dot_dimension_numbers<[1], [1], [0], [0], [0, 0, 1, 0], [], []>} : vector<64x64xbf16>, vector<64x64xbf16>, vector<64x64xf32> -> vector<64x64xf32>
    %cst_28 = arith.constant 1.250000e-01 : f32
    %74 = vector.broadcast %cst_28 : f32 to vector<64x64xf32>
    %75 = arith.mulf %73, %74 : vector<64x64xf32>
    %cst_29 = arith.constant dense<0xFF800000> : vector<64xf32>
    %76 = vector.multi_reduction <maximumf>, %75, %cst_29 [1] : vector<64x64xf32> to vector<64xf32>
    %77 = vector.shape_cast %76 : vector<64xf32> to vector<64x1xf32>
    %78 = vector.broadcast %77 : vector<64x1xf32> to vector<64x64xf32>
    %79 = arith.subf %75, %78 : vector<64x64xf32>
    %80 = math.exp %79 : vector<64x64xf32>
    %cst_30 = arith.constant dense<0.000000e+00> : vector<64xf32>
    %81 = vector.multi_reduction <add>, %80, %cst_30 [1] : vector<64x64xf32> to vector<64xf32>
    %82 = vector.shape_cast %81 : vector<64xf32> to vector<64x1xf32>
    %83 = tpu.reciprocal %82 {approx = true} : vector<64x1xf32> -> vector<64x1xf32>
    %84 = vector.broadcast %83 : vector<64x1xf32> to vector<64x64xf32>
    %85 = arith.mulf %80, %84 : vector<64x64xf32>
    %86 = arith.truncf %85 : vector<64x64xf32> to vector<64x64xbf16>
    %cst_31 = arith.constant dense<0.000000e+00> : vector<64x64xf32>
    %87 = tpu.matmul %86, %72, %cst_31 {dimension_numbers = #tpu.dot_dimension_numbers<[1], [0], [0], [1], [0, 0, 1, 1], [], []>} : vector<64x64xbf16>, vector<64x64xbf16>, vector<64x64xf32> -> vector<64x64xf32>
    %88 = tpu.concatenate %66, %87 in 1 : vector<64x64xf32>, vector<64x64xf32> -> vector<64x128xf32>
    %89 = arith.truncf %88 : vector<64x128xf32> to vector<64x128xbf16>
    %cst_32 = arith.constant dense<0.000000e+00> : vector<64x128xf32>
    %90 = tpu.matmul %89, %12, %cst_32 {dimension_numbers = #tpu.dot_dimension_numbers<[1], [0], [0], [1], [0, 0, 1, 1], [], []>} : vector<64x128xbf16>, vector<128x128xbf16>, vector<64x128xf32> -> vector<64x128xf32>
    %91 = vector.broadcast %6 : vector<1x128xf32> to vector<64x128xf32>
    %92 = arith.addf %90, %91 : vector<64x128xf32>
    %93 = arith.addf %92, %0 : vector<64x128xf32>
    %cst_33 = arith.constant dense<0.000000e+00> : vector<64xf32>
    %94 = vector.multi_reduction <add>, %93, %cst_33 [1] : vector<64x128xf32> to vector<64xf32>
    %95 = vector.shape_cast %94 : vector<64xf32> to vector<64x1xf32>
    %cst_34 = arith.constant 1.280000e+02 : f32
    %96 = vector.broadcast %cst_34 : f32 to vector<64x1xf32>
    %97 = arith.divf %95, %96 : vector<64x1xf32>
    %98 = vector.broadcast %97 : vector<64x1xf32> to vector<64x128xf32>
    %99 = arith.subf %93, %98 : vector<64x128xf32>
    %100 = arith.mulf %99, %99 : vector<64x128xf32>
    %cst_35 = arith.constant dense<0.000000e+00> : vector<64xf32>
    %101 = vector.multi_reduction <add>, %100, %cst_35 [1] : vector<64x128xf32> to vector<64xf32>
    %102 = vector.shape_cast %101 : vector<64xf32> to vector<64x1xf32>
    %cst_36 = arith.constant 1.280000e+02 : f32
    %103 = vector.broadcast %cst_36 : f32 to vector<64x1xf32>
    %104 = arith.divf %102, %103 : vector<64x1xf32>
    %cst_37 = arith.constant 9.99999974E-6 : f32
    %105 = vector.broadcast %cst_37 : f32 to vector<64x1xf32>
    %106 = arith.addf %104, %105 : vector<64x1xf32>
    %107 = math.rsqrt %106 : vector<64x1xf32>
    %108 = vector.broadcast %107 : vector<64x1xf32> to vector<64x128xf32>
    %109 = arith.mulf %99, %108 : vector<64x128xf32>
    %110 = vector.broadcast %7 : vector<1x128xf32> to vector<64x128xf32>
    %111 = arith.mulf %110, %109 : vector<64x128xf32>
    %112 = vector.broadcast %8 : vector<1x128xf32> to vector<64x128xf32>
    %113 = arith.addf %111, %112 : vector<64x128xf32>
    %114 = arith.truncf %113 : vector<64x128xf32> to vector<64x128xbf16>
    %cst_38 = arith.constant dense<0.000000e+00> : vector<64x128xf32>
    %115 = tpu.matmul %114, %13, %cst_38 {dimension_numbers = #tpu.dot_dimension_numbers<[1], [0], [0], [1], [0, 0, 1, 1], [], []>} : vector<64x128xbf16>, vector<128x128xbf16>, vector<64x128xf32> -> vector<64x128xf32>
    %116 = vector.broadcast %9 : vector<1x128xf32> to vector<64x128xf32>
    %117 = arith.addf %115, %116 : vector<64x128xf32>
    %cst_39 = arith.constant 5.000000e-01 : f32
    %118 = vector.broadcast %cst_39 : f32 to vector<64x128xf32>
    %119 = arith.mulf %118, %117 : vector<64x128xf32>
    %120 = arith.mulf %117, %117 : vector<64x128xf32>
    %121 = arith.mulf %120, %117 : vector<64x128xf32>
    %cst_40 = arith.constant 4.471500e-02 : f32
    %122 = vector.broadcast %cst_40 : f32 to vector<64x128xf32>
    %123 = arith.mulf %122, %121 : vector<64x128xf32>
    %124 = arith.addf %117, %123 : vector<64x128xf32>
    %cst_41 = arith.constant 0.797884583 : f32
    %125 = vector.broadcast %cst_41 : f32 to vector<64x128xf32>
    %126 = arith.mulf %125, %124 : vector<64x128xf32>
    %127 = math.tanh %126 : vector<64x128xf32>
    %cst_42 = arith.constant 1.000000e+00 : f32
    %128 = vector.broadcast %cst_42 : f32 to vector<64x128xf32>
    %129 = arith.addf %128, %127 : vector<64x128xf32>
    %130 = arith.mulf %119, %129 : vector<64x128xf32>
    %131 = arith.truncf %130 : vector<64x128xf32> to vector<64x128xbf16>
    %cst_43 = arith.constant dense<0.000000e+00> : vector<64x128xf32>
    %132 = tpu.matmul %131, %14, %cst_43 {dimension_numbers = #tpu.dot_dimension_numbers<[1], [0], [0], [1], [0, 0, 1, 1], [], []>} : vector<64x128xbf16>, vector<128x128xbf16>, vector<64x128xf32> -> vector<64x128xf32>
    %133 = vector.broadcast %10 : vector<1x128xf32> to vector<64x128xf32>
    %134 = arith.addf %132, %133 : vector<64x128xf32>
    %135 = arith.addf %134, %93 : vector<64x128xf32>
    %c0_44 = arith.constant 0 : index
    %c0_45 = arith.constant 0 : index
    %136 = vector.load %arg4[%c0_44, %c0_45] : memref<64x128xf32, #tpu.memory_space<vmem>>, vector<64x128xf32>
    tpu.vector_store %arg4[%c0_44, %c0_45], %135 {strides = array<i32>} : memref<64x128xf32, #tpu.memory_space<vmem>>, vector<64x128xf32>,
    return
  }
  func.func @transform_0(%arg0: i32) -> (i32, i32) {
    %c0_i32 = arith.constant 0 : i32
    %c0_i32_0 = arith.constant 0 : i32
    return %arg0, %c0_i32 : i32, i32
  }
  func.func @transform_1(%arg0: i32) -> (i32, i32) {
    %c0_i32 = arith.constant 0 : i32
    %c0_i32_0 = arith.constant 0 : i32
    %c0_i32_1 = arith.constant 0 : i32
    return %c0_i32, %c0_i32_0 : i32, i32
  }
  func.func @transform_2(%arg0: i32) -> (i32, i32) {
    %c0_i32 = arith.constant 0 : i32
    %c0_i32_0 = arith.constant 0 : i32
    %c0_i32_1 = arith.constant 0 : i32
    return %c0_i32, %c0_i32_0 : i32, i32
  }
  func.func @transform_3(%arg0: i32) -> (i32, i32) {
    %c0_i32 = arith.constant 0 : i32
    %c0_i32_0 = arith.constant 0 : i32
    return %arg0, %c0_i32 : i32, i32
  }
}

</mosaic_0001>

<bundles_post_ra>
// kernel: tpu_custom_call.1
= control target key start
LH: loop header
LB: loop body
LE: loop exit
PB: predicated region body
PF: predicated region fallthrough
CT: control target
= control target key end

     0   :  { %8 = vsyncpa [#allocation3], 0  ;;  %s3491_s0 = inlined_call_operand.hbm [shape: f32[128,128], index: 0, kind: input, shape index: {}]   ;;  %s3492_s1 = inlined_call_operand.hbm [shape: bf16[128,768], index: 1, kind: input, shape index: {}]   ;;  %s3493_s2 = inlined_call_operand.hbm [shape: f32[10,128], index: 2, kind: input, shape index: {}]   ;;  %s3494_s3 = inlined_call_operand.hbm [shape: f32[128,128], index: 3, kind: output, shape index: {}]  }
   0x1   :  { %10 = vsyncpa [#allocation3 + $0x1], 0 }
   0x2   :  { %11 = vsyncpa [#allocation6], 0 }
   0x3   :  { %12 = vsyncpa [#allocation4], 0 }
   0x4   :  { %14 = vsyncpa [#allocation4 + $0x1], 0  ;;  %s2843_s12 = smov 0   ;;  %s2845_s13 = smov 0  }
   0x5   :  { %s2847_s14 = smov 0   ;;  %s2849_s15 = smov 0  }
   0x6 LB: > { %s2864_s16 = sadd.s32 4294967295, %s2809_s15   ;;  %s2040_s17 = sadd.s32 4294967294, %s2809_s15   ;;  %s2809_s15 = sphi %s2849_s15, %s3514_s15   ;;  %s2805_s14 = sphi %s2847_s14, %s3513_s14   ;;  %s2801_s13 = sphi %s2845_s13, %s3512_s13   ;;  %s2797_s12 = sphi %s2843_s12, %s3511_s12  }
   0x7   : > { %p40_p0 = scmp.ne.s32.totalorder %s2801_s13, %s2797_s12  ;;  %p3495_p1 = scmp.eq.s32.totalorder %s2864_s16, 0 }
   0x8   : > { %p112_p3 = scmp.eq.s32.totalorder %s2040_s17, 1  ;;  %p2041_p5 = scmp.ge.s32.totalorder %s2809_s15, 1 }
   0x9   : > { %p2873_p4 = por %p3495_p1, %p40_p0  ;;  %p119_p7 = scmp.lt.s32.totalorder %s2809_s15, 3 }
   0xa   : > { %p2878_p6 = por %p112_p3, %p40_p0  ;;  %s2811_s21 = smov [#allocation5]  }
   0xb   : > { %s3498_s18 = scalar_select %p2873_p4, 1, 0 }
   0xc   : > { %s3499_s19 = scalar_select %p2878_p6, 1, 0 }
   0xd   : > { %p2883_p8 = pnand %p2041_p5, %p119_p7  ;;  %s131_s22 = sshll.u32 %s2811_s21, 4  ;;  %s2887_s22 = int_to_ptr.vmem [resolvable:$true] %s131_s22 }
   0xe   : > { %s2812_s24 = smov [#allocation7]   ;;  %s2653_s28 = scalar_lea.hbm %s3492_s1, 6144 }
   0xf   : > { %p2394_p9 = pneg %p2883_p8  ;;  %s144_s25 = sshll.u32 %s2812_s24, 4  ;;  %s2898_s25 = int_to_ptr.vmem [resolvable:$true] %s144_s25 }
  0x10   : > { %p2654_p12 = scmp.ne.s32.totalorder %s3492_s1, %s2653_s28  ;;  %p2660_p5 = scmp.lt.u32.totalorder %s2653_s28, %s3492_s1 }
  0x11   : > { %p2894_p11 = pnand %p2394_p9, %p3495_p1 }
  0x13   : > { %p2655_p13 = pneg %p2894_p11 }
  0x15   : > { %p2656_p0 = pnand %p2655_p13, %p2654_p12 }
  0x17   : > { %p2657_p3 = pneg %p2656_p0 }
  0x19   : > { %p2662_p7 = pnand %p2660_p5, %p2657_p3 }
  0x1b   : > { %2665 = shalt.err (!%p2662_p7)
}
  0x1c   : > { %s2666_s6 = scalar_lea.vmem %s2887_s22, 6144  ;;  %p2674_p2 = scmp.lt.s32.totalorder %s2887_s22, %s2887_s22 }
  0x1d   : > { %p2667_p9 = scmp.ne.s32.totalorder %s2887_s22, %s2666_s6  ;;  %p2675_p12 = scmp.lt.s32.totalorder %s2666_s6, %s2666_s6 }
  0x1f   : > { %p2669_p10 = pnand %p2667_p9, %p2655_p13  ;;  %p2676_p0 = por %p2675_p12, %p2674_p2 }
  0x21   : > { %p2670_p1 = pneg %p2669_p10 }
  0x23   : > { %p2677_p6 = pnand %p2676_p0, %p2670_p1 }
  0x25   : > { %2680 = shalt.err (!%p2677_p6)
}
  0x26   : > { %s2813_s7 = smov 384   ;;  %s2814_s8 = smov 24  }
  0x27   : > { %2397 = dma.hbm_to_vmem [thread:$0]  (!%p2894_p11), %s3492_s1, 6144, %s2887_s22, [#allocation6], %s2813_s7, %s2813_s7, %s2814_s8  }
  0x28   : > { %s2681_s21 = scalar_lea.hbm %s3493_s2, 256 }
  0x29   : > { %p2682_p2 = scmp.ne.s32.totalorder %s3493_s2, %s2681_s21  ;;  %p2688_p10 = scmp.lt.u32.totalorder %s2681_s21, %s3493_s2 }
  0x2b   : > { %p2684_p1 = pnand %p2682_p2, %p2655_p13 }
  0x2d   : > { %p2685_p6 = pneg %p2684_p1 }
  0x2f   : > { %p2690_p3 = pnand %p2688_p10, %p2685_p6 }
  0x31   : > { %2693 = shalt.err (!%p2690_p3)
}
  0x32   : > { %s2694_s22 = scalar_lea.vmem %s2898_s25, 256  ;;  %p2702_p12 = scmp.lt.s32.totalorder %s2898_s25, %s2898_s25 }
  0x33   : > { %p2695_p5 = scmp.ne.s32.totalorder %s2898_s25, %s2694_s22  ;;  %p2703_p0 = scmp.lt.s32.totalorder %s2694_s22, %s2694_s22 }
  0x35   : > { %p2697_p7 = pnand %p2695_p5, %p2655_p13  ;;  %p2704_p2 = por %p2703_p0, %p2702_p12 }
  0x37   : > { %p2698_p9 = pneg %p2697_p7 }
  0x39   : > { %p2705_p1 = pnand %p2704_p2, %p2698_p9 }
  0x3b   : > { %2708 = shalt.err (!%p2705_p1)
}
  0x3c   : > { %s2815_s29 = smov 128   ;;  %s2816_s30 = smov 8  }
  0x3d   : > { %2400 = dma.hbm_to_vmem [thread:$0]  (!%p2894_p11), %s3493_s2, 256, %s2898_s25, [#allocation6], %s2815_s29, %s2815_s29, %s2816_s30  }
  0x3e   : > { %s2956_s6 = sadd.s32 1, %s2809_s15   ;;  %s27_s8 = sadd.s32 1, %s2805_s14 }
  0x3f   : > { %s24_s7 = ssub.s32 %s2809_s15, %s2956_s6  ;;  %p34_p6 = scmp.ne.s32.totalorder %s2805_s14, %s2801_s13 }
  0x40   : > { %p25_p13 = scmp.eq.s32.totalorder %s24_s7, 0  ;;  %p35_p10 = scmp.eq.s32.totalorder %s2809_s15, 0 }
  0x41   : > { %p3502_p5 = scmp.eq.s32.totalorder %s2864_s16, 1  ;;  %p2411_p9 = scmp.lt.s32.totalorder %s2809_s15, 2 }
  0x42   : > { %s2965_s9 = scalar_select %p25_p13, %s2805_s14, %s27_s8  }
  0x43   : > { %p36_p3 = por %p35_p10, %p34_p6  ;;  %p2969_p7 = por %p3502_p5, %p34_p6 }
  0x44   : > { %s158_s10 = sand.u32 1, %s2805_s14   ;;  %s2132_s25 = sshll.u32 %s2809_s15, 10 }
  0x45   : > { %s3503_s23 = scalar_select %p2969_p7, 1, 0 }
  0x46   : > { %s2045_s11 = sshll.u32 %s158_s10, 6  ;;  %s2979_s24 = scalar_lea.hbm %s3491_s0, %s2132_s25 }
  0x47   : > { %s162_s26 = scalar_lea.vmem [#allocation2], %s2045_s11  ;;  %p2983_p11 = pnand %p2411_p9, %p36_p3 }
  0x48   : > { %s169_s27 = sshll.u32 %s162_s26, 4  ;;  %s2987_s22 = scalar_lea.sflag [#allocation3], %s158_s10  ;;  %s2981_s27 = int_to_ptr.vmem [resolvable:$true] %s169_s27 }
  0x49   : > { %s2709_s4 = scalar_lea.hbm %s2979_s24, 1024  ;;  %p2711_p0 = pneg %p2983_p11 }
  0x4a   : > { %p2710_p12 = scmp.ne.s32.totalorder %s2979_s24, %s2709_s4  ;;  %s2714_s8 = scalar_lea.hbm %s3491_s0, 2048 }
  0x4b   : > { %p2715_p13 = scmp.lt.u32.totalorder %s2979_s24, %s3491_s0  ;;  %p2716_p6 = scmp.lt.u32.totalorder %s2714_s8, %s2709_s4 }
  0x4c   : > { %p2712_p2 = pnand %p2711_p0, %p2710_p12  ;;  %p2718_p3 = scmp.lt.u32.totalorder %s2709_s4, %s2979_s24 }
  0x4d   : > { %p2717_p10 = por %p2716_p6, %p2715_p13 }
  0x4e   : > { %p2713_p1 = pneg %p2712_p2 }
  0x4f   : > { %p2719_p5 = por %p2718_p3, %p2717_p10 }
  0x51   : > { %p2720_p9 = pnand %p2719_p5, %p2713_p1 }
  0x53   : > { %2723 = shalt.err (!%p2720_p9)
}
  0x54   : > { %s2724_s10 = scalar_lea.vmem %s2981_s27, 1024  ;;  %s2817_s17 = smov [#allocation2]  }
  0x55   : > { %p2725_p12 = scmp.ne.s32.totalorder %s2981_s27, %s2724_s10  ;;  %s2729_s21 = sshll.u32 %s2817_s17, 4  ;;  %s2730_s21 = int_to_ptr.vmem [resolvable:$false] %s2729_s21 }
  0x56   : > { %s2731_s26 = scalar_lea.vmem %s2730_s21, 2048  ;;  %p2732_p4 = scmp.lt.s32.totalorder %s2981_s27, %s2730_s21 }
  0x57   : > { %p2727_p2 = pnand %p2725_p12, %p2711_p0  ;;  %p2733_p13 = scmp.lt.s32.totalorder %s2731_s26, %s2724_s10 }
  0x59   : > { %p2728_p7 = pneg %p2727_p2  ;;  %p2734_p6 = por %p2733_p13, %p2732_p4 }
  0x5b   : > { %p2735_p10 = pnand %p2734_p6, %p2728_p7 }
  0x5d   : > { %2738 = shalt.err (!%p2735_p10)
}
  0x5e   : > { %2404 = dma.hbm_to_vmem [thread:$0]  (!%p2983_p11), %s2979_s24, 1024, %s2981_s27, %s2987_s22, %s2815_s29, %s2815_s29, %s2816_s30  }
  0x5f   : > { %181 = sbr.rel (%p2883_p8) target bundleno = 3247 (0xcaf), region = 32  ;;  %s3021_s4 = sand.u32 (!%p2883_p8), 1, %s2801_s13  }
  0x60   : > { %s2049_s5 = sshll.u32 (!%p2883_p8), %s3021_s4, 6  ;;  %s184_s7 = scalar_lea.sflag (!%p2883_p8), [#allocation3], %s3021_s4 }
  0x61   : > { %s3027_s28 = scalar_lea.vmem (!%p2883_p8), [#allocation2], %s2049_s5  ;;  %p3505_p4 = scmp.ne.s32.totalorder (!%p2883_p8), %s3498_s18, 0 }
  0x66   : > { %2784 = dma.done.wait (%p3505_p4), %s184_s7, 1024  }
  0x67   : > { %2786 = vsyncadd (%p3505_p4), %s184_s7, 4294966272  ;;  %p3506_p7 = scmp.eq.s32.totalorder %s2864_s16, 0 }
  0x69   : > { %2788 = dma.done.wait (%p3506_p7), [#allocation6], 6400   ;;  %p3507_p8 = pmov %p3506_p7 }
  0x6a   : > { %v221_v0 = vld [vmem:[%s3027_s28] sm:$0xff]  ;;  %v223_v1 = vld [vmem:[%s3027_s28 + $0x10] sm:$0xff]  ;;  %v222_v2 = vld [vmem:[%s3027_s28 + $0x8] sm:$0xff]  ;;  %v2818_v63 = vmov 0   ;;  %vm750_vm0 = vcmask 523264   ;;  %s2819_s18 = smov 64  }
  0x6b   : > { %2790 = vsyncadd (%p3507_p8), [#allocation6], 4294960896  ;;  %319 = vadd.xlane.f32.xlu0 %v221_v0  ;;  %323 = vadd.xlane.f32.xlu1 %v223_v1  ;;  %v224_v3 = vld [vmem:[%s3027_s28 + $0x18] sm:$0xff]  ;;  %v225_v4 = vld [vmem:[%s3027_s28 + $0x20] sm:$0xff]  ;;  %s217_s20 = scalar_lea.vmem [#allocation8], %s2049_s5  ;;  %s2133_s30 = sshll.u32 %s2864_s16, 10 }
  0x6c   : > { %v226_v5 = vld [vmem:[%s3027_s28 + $0x28] sm:$0xff]  ;;  %v227_v6 = vld [vmem:[%s3027_s28 + $0x30] sm:$0xff]  ;;  %v228_v7 = vld [vmem:[%s3027_s28 + $0x38] sm:$0xff]  ;;  %596 = vmatprep.mubr.bf16.mxu0 %v2818_v63  ;;  %s1948_s29 = sshll.u32 %s217_s20, 4  ;;  %s3446_s16 = scalar_lea.hbm %s3494_s3, %s2133_s30  ;;  %s3439_s29 = int_to_ptr.vmem [resolvable:$true] %s1948_s29 }
  0x6d   : > { %v2477_v8 = vld [vmem:[#allocation5 + $0x4] ss:$24 sps:$4 sm:$0xff]   ;;  %v2479_v9 = vld [vmem:[#allocation5] ss:$24 sps:$4 sm:$0xff]   ;;  %v2480_v10 = vld [vmem:[#allocation5 + $0x34] ss:$24 sps:$4 sm:$0xff]  }
  0x6e   : > { %v2482_v11 = vld [vmem:[#allocation5 + $0x8] ss:$24 sps:$4 sm:$0xff]   ;;  %564 = vmatprep.subr.bf16.mxu0 %v2477_v8  ;;  %v2484_v45 = vld [vmem:[#allocation5 + $0x64] ss:$24 sps:$4 sm:$0xff]   ;;  %v2486_v46 = vld [vmem:[#allocation5 + $0x38] ss:$24 sps:$4 sm:$0xff]  }
  0x6f   : > { %321 = vadd.xlane.f32.xlu0 %v222_v2  ;;  %325 = vadd.xlane.f32.xlu1 %v224_v3  ;;  %v2483_v44 = vld [vmem:[#allocation5 + $0x30] ss:$24 sps:$4 sm:$0xff]   ;;  %v2487_v47 = vld [vmem:[#allocation5 + $0x60] ss:$24 sps:$4 sm:$0xff]   ;;  %v2488_v48 = vld [vmem:[#allocation5 + $0x94] ss:$24 sps:$4 sm:$0xff]  }
  0x70   : > { %565 = vmatpush1.bf16.msra.mxu0 %v2479_v9  ;;  %2214 = vmatprep.subr.bf16.mxu1 %v2482_v11  ;;  %v2490_v49 = vld [vmem:[#allocation5 + $0x68] ss:$24 sps:$4 sm:$0xff]   ;;  %v2492_v51 = vld [vmem:[#allocation5 + $0xc4] ss:$24 sps:$4 sm:$0xff]   ;;  %v2494_v52 = vld [vmem:[#allocation5 + $0x98] ss:$24 sps:$4 sm:$0xff]  }
  0x71   : > { %566 = vmatprep.subr.bf16.mxu0 %v2480_v10  ;;  %2215 = vmatpush3.bf16.msra.mxu1 %v2482_v11  ;;  %v2491_v50 = vld [vmem:[#allocation5 + $0x90] ss:$24 sps:$4 sm:$0xff]   ;;  %v2495_v53 = vld [vmem:[#allocation5 + $0xc0] ss:$24 sps:$4 sm:$0xff]   ;;  %v2496_v54 = vld [vmem:[#allocation5 + $0xf4] ss:$24 sps:$4 sm:$0xff]  }
  0x72   : > { %2216 = vmatprep.subr.bf16.mxu1 %v2486_v46  ;;  %v2498_v55 = vld [vmem:[#allocation5 + $0xc8] ss:$24 sps:$4 sm:$0xff]   ;;  %v2500_v57 = vld [vmem:[#allocation5 + $0x124] ss:$24 sps:$4 sm:$0xff]   ;;  %v2502_v58 = vld [vmem:[#allocation5 + $0xf8] ss:$24 sps:$4 sm:$0xff]  }
  0x73   : > { %327 = vadd.xlane.f32.xlu0 %v225_v4  ;;  %329 = vadd.xlane.f32.xlu1 %v226_v5  ;;  %v2499_v56 = vld [vmem:[#allocation5 + $0xf0] ss:$24 sps:$4 sm:$0xff]   ;;  %v2503_v59 = vld [vmem:[#allocation5 + $0x120] ss:$24 sps:$4 sm:$0xff]   ;;  %v2504_v60 = vld [vmem:[#allocation5 + $0x154] ss:$24 sps:$4 sm:$0xff]  }
  0x74   : > { %567 = vmatpush1.bf16.msra.mxu0 %v2483_v44  ;;  %v2506_v61 = vld [vmem:[#allocation5 + $0x128] ss:$24 sps:$4 sm:$0xff]   ;;  %s1935_s22 = scalar_lea.sflag [#allocation4], %s3021_s4  ;;  %s2739_s8 = scalar_lea.vmem %s3439_s29, 1024 }
  0x75   : > { %568 = vmatprep.subr.bf16.mxu0 %v2484_v45  ;;  %2217 = vmatpush3.bf16.msra.mxu1 %v2486_v46  ;;  %v2507_v62 = vld [vmem:[#allocation5 + $0x150] ss:$24 sps:$4 sm:$0xff]   ;;  %p2740_p11 = scmp.ne.s32.totalorder %s3439_s29, %s2739_s8  ;;  %p3508_p0 = scmp.ne.s32.totalorder %s3503_s23, 0 }
  0x76   : > { %2218 = vmatprep.subr.bf16.mxu1 %v2490_v49  ;;  %s2820_s11 = smov [#allocation8]  }
  0x77   : > { %331 = vadd.xlane.f32.xlu0 %v227_v6  ;;  %333 = vadd.xlane.f32.xlu1 %v228_v7  ;;  %p2741_p1 = pnand %p2740_p11, %p3508_p0  ;;  %s2743_s25 = sshll.u32 %s2820_s11, 4  ;;  %s2744_s25 = int_to_ptr.vmem [resolvable:$false] %s2743_s25 }
  0x78   : > { %569 = vmatpush1.bf16.msra.mxu0 %v2487_v47  ;;  %s2745_s10 = scalar_lea.vmem %s2744_s25, 2048  ;;  %p2746_p5 = scmp.lt.s32.totalorder %s3439_s29, %s2744_s25 }
  0x79   : > { %570 = vmatprep.subr.bf16.mxu0 %v2488_v48  ;;  %2219 = vmatpush3.bf16.msra.mxu1 %v2490_v49  ;;  %p2742_p3 = pneg %p2741_p1  ;;  %p2747_p9 = scmp.lt.s32.totalorder %s2745_s10, %s2739_s8 }
  0x7a   : > { %2220 = vmatprep.subr.bf16.mxu1 %v2494_v52 }
  0x7b   : > { %p2748_p12 = por %p2747_p9, %p2746_p5 }
  0x7c   : > { %571 = vmatpush1.bf16.msra.mxu0 %v2491_v50 }
  0x7d   : > { %572 = vmatprep.subr.bf16.mxu0 %v2492_v51  ;;  %2221 = vmatpush3.bf16.msra.mxu1 %v2494_v52  ;;  %p2749_p2 = pnand %p2748_p12, %p2742_p3 }
  0x7e   : > { %2222 = vmatprep.subr.bf16.mxu1 %v2498_v55 }
  0x80   : > { %573 = vmatpush1.bf16.msra.mxu0 %v2495_v53 }
  0x81   : > { %574 = vmatprep.subr.bf16.mxu0 %v2496_v54  ;;  %2223 = vmatpush3.bf16.msra.mxu1 %v2498_v55 }
  0x82   : > { %2224 = vmatprep.subr.bf16.mxu1 %v2502_v58 }
  0x84   : > { %575 = vmatpush1.bf16.msra.mxu0 %v2499_v56 }
  0x85   : > { %576 = vmatprep.subr.bf16.mxu0 %v2500_v57  ;;  %2225 = vmatpush3.bf16.msra.mxu1 %v2502_v58 }
  0x86   : > { %2226 = vmatprep.subr.bf16.mxu1 %v2506_v61 }
  0x88   : > { %577 = vmatpush1.bf16.msra.mxu0 %v2503_v59 }
  0x89   : > { %578 = vmatprep.subr.bf16.mxu0 %v2504_v60  ;;  %2227 = vmatpush3.bf16.msra.mxu1 %v2506_v61 }
  0x8c   : > { %579 = vmatpush1.bf16.msra.mxu0 %v2507_v62 }
  0xf8   : > { %v320_v12 = vpop.xlane.xlu0 %319  ;;  %v324_v13 = vpop.xlane.xlu1 %323 }
  0xf9   : > { %v336_v14 = vmul.f32 0.0078125, %v320_v12  ;;  %v338_v15 = vmul.f32 0.0078125, %v324_v13 }
  0xfb   : > { %v3045_v16 = vsub.f32 %v221_v0, %v336_v14  ;;  %v3047_v17 = vsub.f32 %v223_v1, %v338_v15  ;;  %v2508_v0 = vld [vmem:[#allocation5 + $0x158] ss:$24 sps:$4 sm:$0xff]  }
  0xfc   : > { %v322_v18 = vpop.xlane.xlu0 %321  ;;  %v326_v19 = vpop.xlane.xlu1 %325  ;;  %2228 = vmatprep.subr.bf16.mxu1 %v2508_v0 }
  0xfd   : > { %v337_v20 = vmul.f32 0.0078125, %v322_v18  ;;  %v352_v21 = vmul.f32 %v3045_v16, %v3045_v16  ;;  %v339_v22 = vmul.f32 0.0078125, %v326_v19  ;;  %v354_v25 = vmul.f32 %v3047_v17, %v3047_v17  ;;  %2229 = vmatpush3.bf16.msra.mxu1 %v2508_v0 }
  0xff   : > { %v3051_v23 = vsub.f32 %v222_v2, %v337_v20  ;;  %360 = vadd.xlane.f32.xlu0 %v352_v21  ;;  %v3053_v24 = vsub.f32 %v224_v3, %v339_v22 }
 0x100   : > { %v328_v26 = vpop.xlane.xlu0 %327  ;;  %v330_v27 = vpop.xlane.xlu1 %329 }
 0x101   : > { %v340_v28 = vmul.f32 0.0078125, %v328_v26  ;;  %v353_v29 = vmul.f32 %v3051_v23, %v3051_v23  ;;  %v341_v30 = vmul.f32 0.0078125, %v330_v27  ;;  %v355_v33 = vmul.f32 %v3053_v24, %v3053_v24 }
 0x103   : > { %v3059_v31 = vsub.f32 %v225_v4, %v340_v28  ;;  %364 = vadd.xlane.f32.xlu0 %v354_v25  ;;  %362 = vadd.xlane.f32.xlu1 %v353_v29  ;;  %v3061_v32 = vsub.f32 %v226_v5, %v341_v30  ;;  %v2053_v30 = vld [vmem:[#allocation7] ss:$0 sm:$0xff] }
 0x104   : > { %v332_v34 = vpop.xlane.xlu0 %331  ;;  %v334_v35 = vpop.xlane.xlu1 %333 }
 0x105   : > { %v342_v36 = vmul.f32 0.0078125, %v332_v34  ;;  %v356_v37 = vmul.f32 %v3059_v31, %v3059_v31  ;;  %v343_v38 = vmul.f32 0.0078125, %v334_v35  ;;  %v357_v41 = vmul.f32 %v3061_v32, %v3061_v32 }
 0x107   : > { %v3067_v39 = vsub.f32 %v227_v6, %v342_v36  ;;  %366 = vadd.xlane.f32.xlu1 %v355_v33  ;;  %368 = vadd.xlane.f32.xlu0 %v356_v37  ;;  %v3069_v40 = vsub.f32 %v228_v7, %v343_v38  ;;  %v2054_v38 = vld [vmem:[#allocation7 + $0x1] ss:$0 sm:$0xff] }
 0x109   : > { %v358_v42 = vmul.f32 %v3067_v39, %v3067_v39  ;;  %v359_v43 = vmul.f32 %v3069_v40, %v3069_v40 }
 0x10b   : > { %370 = vadd.xlane.f32.xlu1 %v357_v41  ;;  %372 = vadd.xlane.f32.xlu0 %v358_v42 }
 0x10f   : > { %374 = vadd.xlane.f32.xlu1 %v359_v43 }
 0x18c   : > { %v361_v1 = vpop.xlane.xlu0 %360 }
 0x18d   : > { %v376_v2 = vmul.f32 0.0078125, %v361_v1 }
 0x18f   : > { %v384_v3 = vadd.f32 1e-05, %v376_v2 }
 0x190   : > { %v363_v4 = vpop.xlane.xlu1 %362  ;;  %v365_v5 = vpop.xlane.xlu0 %364 }
 0x191   : > { %2533 = vrsqrt.f32 %v384_v3  ;;  %v377_v6 = vmul.f32 0.0078125, %v363_v4  ;;  %v378_v7 = vmul.f32 0.0078125, %v365_v5  ;;  %v3091_v3 = vld [vmem:[#allocation7 + $0x3] ss:$0 sm:$0xff] }
 0x193   : > { %v385_v8 = vadd.f32 1e-05, %v377_v6  ;;  %v386_v9 = vadd.f32 1e-05, %v378_v7 }
 0x194   : > { %v367_v10 = vpop.xlane.xlu1 %366  ;;  %v369_v11 = vpop.xlane.xlu0 %368 }
 0x195   : > { %2535 = vrsqrt.f32 %v385_v8  ;;  %v379_v12 = vmul.f32 0.0078125, %v367_v10  ;;  %v380_v13 = vmul.f32 0.0078125, %v369_v11  ;;  %v2081_v10 = vld [vmem:[#allocation7 + $0x4] ss:$0 sm:$0xff] }
 0x196   : > { %2537 = vrsqrt.f32 %v386_v9 }
 0x197   : > { %v387_v14 = vadd.f32 1e-05, %v379_v12  ;;  %v388_v15 = vadd.f32 1e-05, %v380_v13 }
 0x198   : > { %v371_v18 = vpop.xlane.xlu1 %370  ;;  %v373_v19 = vpop.xlane.xlu0 %372 }
 0x199   : > { %2539 = vrsqrt.f32 %v387_v14  ;;  %v381_v20 = vmul.f32 0.0078125, %v371_v18  ;;  %v382_v21 = vmul.f32 0.0078125, %v373_v19 }
 0x19a   : > { %2541 = vrsqrt.f32 %v388_v15 }
 0x19b   : > { %v2534_v22 = vpop.eup %2533  ;;  %v389_v25 = vadd.f32 1e-05, %v381_v20  ;;  %v390_v26 = vadd.f32 1e-05, %v382_v21 }
 0x19c   : > { %v375_v27 = vpop.xlane.xlu1 %374  ;;  %v400_v28 = vmul.f32 %v2534_v22, %v3045_v16 }
 0x19d   : > { %2543 = vrsqrt.f32 %v389_v25  ;;  %v383_v29 = vmul.f32 0.0078125, %v375_v27 }
 0x19e   : > { %2545 = vrsqrt.f32 %v390_v26  ;;  %v412_v37 = vmul.f32 %v2053_v30, %v400_v28 }
 0x19f   : > { %v2536_v33 = vpop.eup %2535  ;;  %v391_v34 = vadd.f32 1e-05, %v383_v29 }
 0x1a0   : > { %v2538_v35 = vpop.eup %2537  ;;  %v401_v36 = vmul.f32 %v2536_v33, %v3051_v23  ;;  %v424_v46 = vadd.f32 %v2054_v38, %v412_v37 }
 0x1a1   : > { %2547 = vrsqrt.f32 %v391_v34  ;;  %v402_v41 = vmul.f32 %v2538_v35, %v3047_v17 }
 0x1a2   : > { %v413_v42 = vmul.f32 %v2053_v30, %v401_v36 }
 0x1a3   : > { %v2540_v43 = vpop.eup %2539  ;;  %v414_v44 = vmul.f32 %v2053_v30, %v402_v41 }
 0x1a4   : > { %v2542_v45 = vpop.eup %2541  ;;  %v425_v16 = vadd.f32 %v2054_v38, %v413_v42  ;;  %v403_v47 = vmul.f32 %v2540_v43, %v3053_v24 }
 0x1a5   : > { %v404_v48 = vmul.f32 %v2542_v45, %v3059_v31  ;;  %v426_v52 = vadd.f32 %v2054_v38, %v414_v44 }
 0x1a6   : > { %v432_v49 = vpack.c.bf16 %v425_v16, %v424_v46  ;;  %v415_v50 = vmul.f32 %v2053_v30, %v403_v47 }
 0x1a7   : > { %v2544_v51 = vpop.eup %2543  ;;  %v416_v54 = vmul.f32 %v2053_v30, %v404_v48 }
 0x1a8   : > { %v2546_v23 = vpop.eup %2545  ;;  %597 = vmatmul.mubr.bf16.vlgmr.msra.gmra.mrb[0].mxu0 %v432_v49  ;;  %2230 = vmatprep.mubr.bf16.mxu1 %v432_v49  ;;  %v427_v53 = vadd.f32 %v2054_v38, %v415_v50  ;;  %v405_v17 = vmul.f32 %v2544_v51, %v3061_v32 }
 0x1a9   : > { %606 = vmatprep.mubr.bf16.mxu0 %v2818_v63  ;;  %v406_v55 = vmul.f32 %v2546_v23, %v3067_v39  ;;  %v428_v31 = vadd.f32 %v2054_v38, %v416_v54  ;;  %v3089_v39 = vld [vmem:[#allocation7 + $0x2] ss:$0 sm:$0xff] }
 0x1aa   : > { %v433_v56 = vpack.c.bf16 %v427_v53, %v426_v52  ;;  %v417_v57 = vmul.f32 %v2053_v30, %v405_v17 }
 0x1ab   : > { %v2548_v24 = vpop.eup %2547  ;;  %v418_v60 = vmul.f32 %v2053_v30, %v406_v55 }
 0x1ac   : > { %2231 = vmatmul.mubr.bf16.vlgmr.msra.gmra.mrb[0].mxu1 %v433_v56  ;;  %v429_v58 = vadd.f32 %v2054_v38, %v417_v57  ;;  %v407_v59 = vmul.f32 %v2548_v24, %v3069_v40 }
 0x1ad   : > { %v430_v0 = vadd.f32 %v2054_v38, %v418_v60 }
 0x1ae   : > { %v434_v61 = vpack.c.bf16 %v429_v58, %v428_v31  ;;  %v419_v62 = vmul.f32 %v2053_v30, %v407_v59 }
 0x1b0   : > { %607 = vmatmul.mubr.bf16.gmra.mrb[4].mxu0 %v433_v56  ;;  %2234 = vmatprep.mubr.bf16.mxu1 %v434_v61  ;;  %v431_v32 = vadd.f32 %v2054_v38, %v419_v62 }
 0x1b1   : > { %616 = vmatprep.mubr.bf16.mxu0 %v2818_v63 }
 0x1b2   : > { %v435_v1 = vpack.c.bf16 %v431_v32, %v430_v0 }
 0x1b4   : > { %2235 = vmatmul.mubr.bf16.gmra.mrb[4].mxu1 %v435_v1 }
 0x1b8   : > { %617 = vmatmul.mubr.bf16.gmra.mrb[8].mxu0 %v434_v61 }
 0x1b9   : > { %626 = vmatprep.mubr.bf16.mxu0 %v2818_v63 }
 0x1c0   : > { %627 = vmatmul.mubr.bf16.gmra.mrb[12].mxu0 %v435_v1 }
 0x27b   : > { %v598_v2 = vpop.f32.mrb[0].mxu0 }
 0x27c   : > { %v600_v40 = vpop.f32.mrb[1].mxu0  ;;  %v706_v5 = vadd.f32 %v3089_v39, %v598_v2 }
 0x27d   : > { %v602_v4 = vpop.f32.mrb[2].mxu0  ;;  %v718_v8 = vadd.f32 %v3091_v3, %v600_v40 }
 0x27e   : > { %v707_v6 = vadd.f32 %v3089_v39, %v602_v4  ;;  %v604_v7 = vpop.f32.mrb[3].mxu0 }
 0x27f   : > { %v719_v9 = vadd.f32 %v3091_v3, %v604_v7  ;;  %v2232_v11 = vpop.f32.mrb[0].mxu1 }
 0x280   : > { %v3097_v63 = vpack.c.bf16 %v707_v6, %v706_v5  ;;  %v671_v12 = vpop.f32.mrb[1].mxu1  ;;  %v732_v15 = vadd.f32 %v2232_v11, %v2081_v10 }
 0x281   : > { %v3099_v13 = vpack.c.bf16 %v719_v9, %v718_v8  ;;  %v2233_v14 = vpop.f32.mrb[2].mxu1  ;;  %v730_v20 = vadd.f32 %v2081_v10, %v671_v12 }
 0x282   : > { %v733_v18 = vadd.f32 %v2233_v14, %v2081_v10  ;;  %v674_v19 = vpop.f32.mrb[3].mxu1  ;;  %2246 = vmatprep.mubr.msk.bf16.mxu0 %vm750_vm0, %v3097_v63 }
 0x283   : > { %v731_v21 = vadd.f32 %v2081_v10, %v674_v19  ;;  %v608_v22 = vpop.f32.mrb[4].mxu0  ;;  %2374 = vmatprep.subr.msk.bf16.mxu0 %vm750_vm0, %v3099_v13  ;;  %v764_v25 = vsel %vm750_vm0, %v3099_v13, 0 }
 0x284   : > { %v3107_v26 = vpack.c.bf16 %v733_v18, %v732_v15  ;;  %v610_v27 = vpop.f32.mrb[5].mxu0  ;;  %2239 = vmatpush3.bf16.xpose.msra.mxu0 %v764_v25  ;;  %v708_v30 = vadd.f32 %v3089_v39, %v608_v22 }
 0x285   : > { %v3109_v28 = vpack.c.bf16 %v731_v21, %v730_v20  ;;  %v612_v29 = vpop.f32.mrb[6].mxu0  ;;  %v720_v35 = vadd.f32 %v3091_v3, %v610_v27 }
 0x286   : > { %v709_v33 = vadd.f32 %v3089_v39, %v612_v29  ;;  %v614_v34 = vpop.f32.mrb[7].mxu0 }
 0x287   : > { %v721_v36 = vadd.f32 %v3091_v3, %v614_v34  ;;  %v2236_v37 = vpop.f32.mrb[4].mxu1  ;;  %2254 = vmatprep.subr.bf16.mxu1 %v3109_v28 }
 0x288   : > { %v3116_v38 = vpack.c.bf16 %v709_v33, %v708_v30  ;;  %v687_v41 = vpop.f32.mrb[5].mxu1  ;;  %2255 = vmatpush3.bf16.msra.mxu1 %v3109_v28  ;;  %v736_v44 = vadd.f32 %v2236_v37, %v2081_v10 }
 0x289   : > { %v3119_v42 = vpack.c.bf16 %v721_v36, %v720_v35  ;;  %v2237_v43 = vpop.f32.mrb[6].mxu1  ;;  %2256 = vmatprep.subr.bf16.mxu1 %v3107_v26  ;;  %v734_v16 = vadd.f32 %v2081_v10, %v687_v41 }
 0x28a   : > { %v737_v45 = vadd.f32 %v2237_v43, %v2081_v10  ;;  %v690_v46 = vpop.f32.mrb[7].mxu1 }
 0x28b   : > { %v735_v47 = vadd.f32 %v2081_v10, %v690_v46  ;;  %v618_v48 = vpop.f32.mrb[8].mxu0  ;;  %2375 = vmatprep.subr.msk.bf16.mxu0 %vm750_vm0, %v3119_v42  ;;  %v767_v49 = vsel %vm750_vm0, %v3119_v42, 0 }
 0x28c   : > { %v3126_v50 = vpack.c.bf16 %v737_v45, %v736_v44  ;;  %v620_v51 = vpop.f32.mrb[9].mxu0  ;;  %2241 = vmatpush3.bf16.xpose.msra.mxu0 %v767_v49  ;;  %2257 = vmatpush3.bf16.msra.mxu1 %v3107_v26  ;;  %v710_v53 = vadd.f32 %v3089_v39, %v618_v48 }
 0x28d   : > { %v3129_v52 = vpack.c.bf16 %v735_v47, %v734_v16  ;;  %v622_v23 = vpop.f32.mrb[10].mxu0  ;;  %v722_v55 = vadd.f32 %v3091_v3, %v620_v51 }
 0x28e   : > { %v711_v17 = vadd.f32 %v3089_v39, %v622_v23  ;;  %v624_v54 = vpop.f32.mrb[11].mxu0 }
 0x28f   : > { %v723_v56 = vadd.f32 %v3091_v3, %v624_v54  ;;  %2258 = vmatprep.subr.bf16.mxu1 %v3129_v52 }
 0x290   : > { %v3136_v57 = vpack.c.bf16 %v711_v17, %v710_v53  ;;  %2259 = vmatpush3.bf16.msra.mxu1 %v3129_v52 }
 0x291   : > { %v3139_v24 = vpack.c.bf16 %v723_v56, %v722_v55  ;;  %2260 = vmatprep.subr.bf16.mxu1 %v3126_v50 }
 0x293   : > { %v628_v31 = vpop.f32.mrb[12].mxu0  ;;  %2376 = vmatprep.subr.msk.bf16.mxu0 %vm750_vm0, %v3139_v24  ;;  %v770_v58 = vsel %vm750_vm0, %v3139_v24, 0 }
 0x294   : > { %v630_v59 = vpop.f32.mrb[13].mxu0  ;;  %2243 = vmatpush3.bf16.xpose.msra.mxu0 %v770_v58  ;;  %2261 = vmatpush3.bf16.msra.mxu1 %v3126_v50  ;;  %v712_v61 = vadd.f32 %v3089_v39, %v628_v31 }
 0x295   : > { %v632_v60 = vpop.f32.mrb[14].mxu0  ;;  %v724_v32 = vadd.f32 %v3091_v3, %v630_v59 }
 0x296   : > { %v713_v62 = vadd.f32 %v3089_v39, %v632_v60  ;;  %v634_v0 = vpop.f32.mrb[15].mxu0 }
 0x297   : > { %v725_v1 = vadd.f32 %v3091_v3, %v634_v0 }
 0x298   : > { %v3151_v2 = vpack.c.bf16 %v713_v62, %v712_v61 }
 0x299   : > { %v3153_v40 = vpack.c.bf16 %v725_v1, %v724_v32 }
 0x29b   : > { %2377 = vmatprep.subr.msk.bf16.mxu0 %vm750_vm0, %v3153_v40  ;;  %v773_v4 = vsel %vm750_vm0, %v3153_v40, 0 }
 0x29c   : > { %2245 = vmatpush3.bf16.xpose.msra.mxu0 %v773_v4 }
 0x2a3   : > { %2247 = vmatmul.mubr.msk.bf16.vlgmr.msra.gmra.mrb[16].mxu0 %vm750_vm0, %v3116_v38 }
 0x2a4   : > { %2250 = vmatprep.mubr.msk.bf16.mxu0 %vm750_vm0, %v3136_v57 }
 0x2ab   : > { %2251 = vmatmul.mubr.msk.bf16.gmra.mrb[20].mxu0 %vm750_vm0, %v3151_v2 }
 0x376   : > { %v2248_v39 = vpop.f32.mrb[16].mxu0 }
 0x377   : > { %v809_v3 = vpop.f32.mrb[17].mxu0  ;;  %v842_v8 = vmul.f32 0.125, %v2248_v39 }
 0x378   : > { %v840_v5 = vmul.f32 0.125, %v809_v3  ;;  %v2249_v6 = vpop.f32.mrb[18].mxu0 }
 0x379   : > { %v812_v7 = vpop.f32.mrb[19].mxu0  ;;  %v843_v11 = vmul.f32 0.125, %v2249_v6  ;;  %v854_v15 = vsel %vm750_vm0, %v842_v8, -inf }
 0x37a   : > { %v841_v9 = vmul.f32 0.125, %v812_v7  ;;  %v848_v10 = vsel %vm750_vm0, %v840_v5, -inf }
 0x37b   : > { %849 = vmax.xlane.f32.xlu0 %v848_v10  ;;  %v857_v21 = vsel %vm750_vm0, %v843_v11, -inf }
 0x37c   : > { %v851_v12 = vsel %vm750_vm0, %v841_v9, -inf }
 0x37d   : > { %852 = vmax.xlane.f32.xlu1 %v851_v12 }
 0x37e   : > { %v2252_v14 = vpop.f32.mrb[20].mxu0 }
 0x37f   : > { %855 = vmax.xlane.f32.xlu0 %v854_v15  ;;  %v825_v18 = vpop.f32.mrb[21].mxu0  ;;  %v846_v25 = vmul.f32 0.125, %v2252_v14 }
 0x380   : > { %v844_v19 = vmul.f32 0.125, %v825_v18  ;;  %v2253_v20 = vpop.f32.mrb[22].mxu0 }
 0x381   : > { %858 = vmax.xlane.f32.xlu1 %v857_v21  ;;  %v828_v22 = vpop.f32.mrb[23].mxu0  ;;  %v847_v30 = vmul.f32 0.125, %v2253_v20  ;;  %v866_v34 = vsel %vm750_vm0, %v846_v25, -inf }
 0x382   : > { %v3169_v27 = vmul.f32 0.125, %v828_v22  ;;  %v860_v29 = vsel %vm750_vm0, %v844_v19, -inf }
 0x383   : > { %861 = vmax.xlane.f32.xlu0 %v860_v29  ;;  %v869_v35 = vsel %vm750_vm0, %v847_v30, -inf }
 0x384   : > { %v863_v33 = vsel %vm750_vm0, %v3169_v27, -inf }
 0x385   : > { %864 = vmax.xlane.f32.xlu1 %v863_v33 }
 0x387   : > { %867 = vmax.xlane.f32.xlu0 %v866_v34 }
 0x389   : > { %870 = vmax.xlane.f32.xlu1 %v869_v35 }
 0x408   : > { %v850_v36 = vpop.xlane.xlu0 %849 }
 0x409   : > { %v872_v37 = vsub.f32 %v840_v5, %v850_v36 }
 0x40a   : > { %v853_v41 = vpop.xlane.xlu1 %852 }
 0x40b   : > { %v873_v44 = vsub.f32 %v841_v9, %v853_v41  ;;  %v880_v46 = vmul.f32 1.442695, %v872_v37 }
 0x40c   : > { %v856_v43 = vpop.xlane.xlu0 %855 }
 0x40d   : > { %v874_v45 = vsub.f32 %v842_v8, %v856_v43  ;;  %v882_v51 = vmul.f32 1.442695, %v873_v44 }
 0x40e   : > { %v859_v16 = vpop.xlane.xlu1 %858 }
 0x40f   : > { %v884_v47 = vmul.f32 1.442695, %v874_v45  ;;  %v875_v48 = vsub.f32 %v843_v11, %v859_v16 }
 0x410   : > { %v862_v49 = vpop.xlane.xlu0 %861 }
 0x411   : > { %2549 = vpow2.f32 %v884_v47  ;;  %v886_v23 = vmul.f32 1.442695, %v875_v48  ;;  %v876_v53 = vsub.f32 %v844_v19, %v862_v49 }
 0x412   : > { %2551 = vpow2.f32 %v880_v46  ;;  %v865_v5 = vpop.xlane.xlu1 %864 }
 0x413   : > { %2553 = vpow2.f32 %v886_v23  ;;  %v888_v55 = vmul.f32 1.442695, %v876_v53  ;;  %v877_v8 = vsub.f32 %v3169_v27, %v865_v5 }
 0x414   : > { %v868_v17 = vpop.xlane.xlu0 %867  ;;  %2555 = vpow2.f32 %v882_v51 }
 0x415   : > { %v878_v54 = vsub.f32 %v846_v25, %v868_v17  ;;  %v890_v10 = vmul.f32 1.442695, %v877_v8 }
 0x416   : > { %v871_v6 = vpop.xlane.xlu1 %870 }
 0x417   : > { %v892_v56 = vmul.f32 1.442695, %v878_v54  ;;  %v879_v7 = vsub.f32 %v847_v30, %v871_v6 }
 0x419   : > { %2557 = vpow2.f32 %v892_v56  ;;  %v894_v9 = vmul.f32 1.442695, %v879_v7 }
 0x41a   : > { %2559 = vpow2.f32 %v888_v55 }
 0x41b   : > { %v2550_v31 = vpop.eup %2549  ;;  %2561 = vpow2.f32 %v894_v9 }
 0x41c   : > { %v2552_v58 = vpop.eup %2551  ;;  %v902_v59 = vsel %vm750_vm0, %v2550_v31, 0.0  ;;  %2563 = vpow2.f32 %v890_v10 }
 0x41d   : > { %v2554_v60 = vpop.eup %2553  ;;  %903 = vadd.xlane.f32.xlu0 %v902_v59  ;;  %v896_v0 = vsel %vm750_vm0, %v2552_v58, 0.0 }
 0x41e   : > { %v905_v61 = vsel %vm750_vm0, %v2554_v60, 0.0  ;;  %v2556_v62 = vpop.eup %2555 }
 0x41f   : > { %906 = vadd.xlane.f32.xlu1 %v905_v61  ;;  %v899_v32 = vsel %vm750_vm0, %v2556_v62, 0.0 }
 0x421   : > { %897 = vadd.xlane.f32.xlu0 %v896_v0 }
 0x423   : > { %v3180_v1 = vpop.eup %2557  ;;  %900 = vadd.xlane.f32.xlu1 %v899_v32 }
 0x424   : > { %v914_v4 = vsel %vm750_vm0, %v3180_v1, 0.0  ;;  %v3184_v39 = vpop.eup %2559 }
 0x425   : > { %915 = vadd.xlane.f32.xlu0 %v914_v4  ;;  %v908_v3 = vsel %vm750_vm0, %v3184_v39, 0.0 }
 0x429   : > { %909 = vadd.xlane.f32.xlu0 %v908_v3 }
 0x434   : > { %1035 = vrot.lane.b32.xlu1 %v3119_v42, %s2819_s18  ;;  %v2562_v42 = vpop.eup %2561 }
 0x435   : > { %v2564_v11 = vpop.eup %2563 }
 0x438   : > { %1037 = vrot.lane.b32.xlu1 %v3139_v24, %s2819_s18  ;;  %v917_v24 = vsel %vm750_vm0, %v2562_v42, 0.0 }
 0x43f   : > { %1033 = vrot.lane.b32.xlu0 %v3099_v13, %s2819_s18  ;;  %v911_v13 = vsel %vm750_vm0, %v2564_v11, 0.0 }
 0x443   : > { %1021 = vrot.lane.b32.xlu0 %v3097_v63, %s2819_s18 }
 0x447   : > { %1025 = vrot.lane.b32.xlu0 %v3136_v57, %s2819_s18 }
 0x45c   : > { %918 = vadd.xlane.f32.xlu1 %v917_v24 }
 0x460   : > { %912 = vadd.xlane.f32.xlu1 %v911_v13 }
 0x471   : > { %1039 = vrot.lane.b32.xlu1 %v3153_v40, %s2819_s18 }
 0x475   : > { %1023 = vrot.lane.b32.xlu1 %v3116_v38, %s2819_s18 }
 0x479   : > { %1027 = vrot.lane.b32.xlu1 %v3151_v2, %s2819_s18 }
 0x4aa   : > { %v904_v63 = vpop.xlane.xlu0 %903 }
 0x4ac   : > { %v907_v57 = vpop.xlane.xlu1 %906 }
 0x4ad   : > { %2565 = vrcp.f32 %v907_v57 }
 0x4ae   : > { %v898_v12 = vpop.xlane.xlu0 %897 }
 0x4af   : > { %2567 = vrcp.f32 %v898_v12 }
 0x4b0   : > { %2569 = vrcp.f32 %v904_v63  ;;  %v901_v14 = vpop.xlane.xlu1 %900 }
 0x4b1   : > { %2571 = vrcp.f32 %v901_v14 }
 0x4b2   : > { %v916_v15 = vpop.xlane.xlu0 %915 }
 0x4b4   : > { %v1036_v34 = vpop.permute.xlu1 %1035 }
 0x4b5   : > { %v1057_v35 = vsel %vm750_vm0, %v1036_v34, 0 }
 0x4b6   : > { %v910_v18 = vpop.xlane.xlu0 %909 }
 0x4b7   : > { %v2566_v19 = vpop.eup %2565 }
 0x4b8   : > { %v931_v25 = vmul.f32 %v2566_v19, %v2554_v60  ;;  %v1038_v36 = vpop.permute.xlu1 %1037 }
 0x4b9   : > { %v2568_v20 = vpop.eup %2567  ;;  %v1060_v37 = vsel %vm750_vm0, %v1038_v36, 0 }
 0x4ba   : > { %v2570_v21 = vpop.eup %2569  ;;  %v1034_v40 = vpop.permute.xlu0 %1033  ;;  %v928_v38 = vmul.f32 %v2568_v20, %v2552_v58 }
 0x4bb   : > { %v2572_v22 = vpop.eup %2571  ;;  %2378 = vmatprep.subr.msk.bf16.mxu1 %vm750_vm0, %v1034_v40  ;;  %v930_v27 = vmul.f32 %v2570_v21, %v2550_v31  ;;  %v1054_v33 = vsel %vm750_vm0, %v1034_v40, 0 }
 0x4bc   : > { %v929_v2 = vmul.f32 %v2572_v22, %v2556_v62 }
 0x4bd   : > { %v937_v30 = vpack.c.bf16 %v931_v25, %v930_v27 }
 0x4be   : > { %v936_v29 = vpack.c.bf16 %v929_v2, %v928_v38  ;;  %v1022_v55 = vpop.permute.xlu0 %1021 }
 0x4c0   : > { %2262 = vmatprep.mubr.msk.bf16.mxu1 %vm750_vm0, %v936_v29 }
 0x4c1   : > { %2263 = vmatmul.mubr.msk.bf16.vlgmr.msra.gmra.mrb[8].mxu1 %vm750_vm0, %v937_v30 }
 0x4c2   : > { %2271 = vmatpush3.bf16.xpose.msra.mxu1 %v1054_v33  ;;  %v1026_v31 = vpop.permute.xlu0 %1025 }
 0x4c3   : > { %2379 = vmatprep.subr.msk.bf16.mxu1 %vm750_vm0, %v1036_v34 }
 0x4ca   : > { %2273 = vmatpush3.bf16.xpose.msra.mxu1 %v1057_v35 }
 0x4cb   : > { %2380 = vmatprep.subr.msk.bf16.mxu1 %vm750_vm0, %v1038_v36 }
 0x4d2   : > { %2275 = vmatpush3.bf16.xpose.msra.mxu1 %v1060_v37 }
 0x4e9   : > { %v919_v41 = vpop.xlane.xlu1 %918 }
 0x4ea   : > { %2573 = vrcp.f32 %v919_v41 }
 0x4eb   : > { %2575 = vrcp.f32 %v910_v18 }
 0x4ec   : > { %2577 = vrcp.f32 %v916_v15 }
 0x4ed   : > { %v913_v43 = vpop.xlane.xlu1 %912 }
 0x4ee   : > { %2579 = vrcp.f32 %v913_v43 }
 0x4f1   : > { %v1040_v44 = vpop.permute.xlu1 %1039 }
 0x4f2   : > { %v1063_v45 = vsel %vm750_vm0, %v1040_v44, 0  ;;  %2381 = vmatprep.subr.msk.bf16.mxu1 %vm750_vm0, %v1040_v44 }
 0x4f3   : > { %2277 = vmatpush3.bf16.xpose.msra.mxu1 %v1063_v45 }
 0x4f4   : > { %v2574_v46 = vpop.eup %2573 }
 0x4f5   : > { %v2576_v16 = vpop.eup %2575  ;;  %v935_v49 = vmul.f32 %v2574_v46, %v2562_v42  ;;  %v1024_v56 = vpop.permute.xlu1 %1023 }
 0x4f6   : > { %v2578_v47 = vpop.eup %2577  ;;  %v932_v51 = vmul.f32 %v2576_v16, %v3184_v39 }
 0x4f7   : > { %v934_v53 = vmul.f32 %v2578_v47, %v3180_v1 }
 0x4f8   : > { %v2580_v48 = vpop.eup %2579 }
 0x4f9   : > { %v933_v23 = vmul.f32 %v2580_v48, %v2564_v11  ;;  %v939_v54 = vpack.c.bf16 %v935_v49, %v934_v53  ;;  %v1028_v58 = vpop.permute.xlu1 %1027 }
 0x4fb   : > { %v938_v17 = vpack.c.bf16 %v933_v23, %v932_v51 }
 0x4fd   : > { %2266 = vmatprep.mubr.msk.bf16.mxu1 %vm750_vm0, %v938_v17 }
 0x4fe   : > { %2267 = vmatmul.mubr.msk.bf16.gmra.mrb[12].mxu1 %vm750_vm0, %v939_v54 }
 0x4ff   : > { %2278 = vmatprep.mubr.msk.bf16.mxu1 %vm750_vm0, %v1022_v55 }
 0x506   : > { %2279 = vmatmul.mubr.msk.bf16.vlgmr.msra.gmra.mrb[16].mxu1 %vm750_vm0, %v1024_v56 }
 0x507   : > { %2282 = vmatprep.mubr.msk.bf16.mxu1 %vm750_vm0, %v1026_v31 }
 0x50e   : > { %2283 = vmatmul.mubr.msk.bf16.gmra.mrb[20].mxu1 %vm750_vm0, %v1028_v58 }
 0x594   : > { %v3225_v59 = vpop.f32.mrb[8].mxu1 }
 0x595   : > { %v3227_v60 = vpop.f32.mrb[9].mxu1 }
 0x596   : > { %v3229_v61 = vpop.f32.mrb[10].mxu1 }
 0x597   : > { %v3231_v62 = vpop.f32.mrb[11].mxu1 }
 0x5d1   : > { %v3233_v0 = vpop.f32.mrb[12].mxu1 }
 0x5d2   : > { %v3235_v32 = vpop.f32.mrb[13].mxu1 }
 0x5d3   : > { %v3237_v1 = vpop.f32.mrb[14].mxu1 }
 0x5d4   : > { %v3239_v4 = vpop.f32.mrb[15].mxu1 }
 0x5d9   : > { %v2280_v39 = vpop.f32.mrb[16].mxu1 }
 0x5da   : > { %v1099_v3 = vpop.f32.mrb[17].mxu1  ;;  %v1132_v8 = vmul.f32 0.125, %v2280_v39 }
 0x5db   : > { %v1130_v5 = vmul.f32 0.125, %v1099_v3  ;;  %v2281_v6 = vpop.f32.mrb[18].mxu1 }
 0x5dc   : > { %v1102_v7 = vpop.f32.mrb[19].mxu1  ;;  %v1133_v24 = vmul.f32 0.125, %v2281_v6  ;;  %v1144_v13 = vsel %vm750_vm0, %v1132_v8, -inf }
 0x5dd   : > { %v1131_v9 = vmul.f32 0.125, %v1102_v7  ;;  %v1138_v10 = vsel %vm750_vm0, %v1130_v5, -inf }
 0x5de   : > { %1139 = vmax.xlane.f32.xlu0 %v1138_v10  ;;  %v1147_v18 = vsel %vm750_vm0, %v1133_v24, -inf }
 0x5df   : > { %v1141_v42 = vsel %vm750_vm0, %v1131_v9, -inf }
 0x5e0   : > { %1142 = vmax.xlane.f32.xlu1 %v1141_v42 }
 0x5e1   : > { %v2284_v11 = vpop.f32.mrb[20].mxu1 }
 0x5e2   : > { %1145 = vmax.xlane.f32.xlu0 %v1144_v13  ;;  %v1115_v63 = vpop.f32.mrb[21].mxu1  ;;  %v1136_v21 = vmul.f32 0.125, %v2284_v11 }
 0x5e3   : > { %v2285_v57 = vpop.f32.mrb[22].mxu1  ;;  %v1134_v14 = vmul.f32 0.125, %v1115_v63 }
 0x5e4   : > { %v1118_v12 = vpop.f32.mrb[23].mxu1  ;;  %v1137_v19 = vmul.f32 0.125, %v2285_v57  ;;  %v1156_v25 = vsel %vm750_vm0, %v1136_v21, -inf }
 0x5e5   : > { %v3244_v15 = vmul.f32 0.125, %v1118_v12  ;;  %v1150_v40 = vsel %vm750_vm0, %v1134_v14, -inf }
 0x5e6   : > { %1148 = vmax.xlane.f32.xlu0 %v1147_v18  ;;  %v1159_v22 = vsel %vm750_vm0, %v1137_v19, -inf }
 0x5e7   : > { %v1153_v20 = vsel %vm750_vm0, %v3244_v15, -inf }
 0x5e8   : > { %1154 = vmax.xlane.f32.xlu1 %v1153_v20 }
 0x5ea   : > { %1151 = vmax.xlane.f32.xlu0 %v1150_v40 }
 0x5ec   : > { %1160 = vmax.xlane.f32.xlu1 %v1159_v22 }
 0x5ee   : > { %1157 = vmax.xlane.f32.xlu0 %v1156_v25 }
 0x66b   : > { %v1140_v38 = vpop.xlane.xlu0 %1139 }
 0x66c   : > { %v1162_v2 = vsub.f32 %v1130_v5, %v1140_v38 }
 0x66d   : > { %v1143_v27 = vpop.xlane.xlu1 %1142 }
 0x66e   : > { %v1170_v33 = vmul.f32 1.442695, %v1162_v2  ;;  %v1163_v34 = vsub.f32 %v1131_v9, %v1143_v27 }
 0x66f   : > { %v1146_v29 = vpop.xlane.xlu0 %1145 }
 0x670   : > { %v1164_v30 = vsub.f32 %v1132_v8, %v1146_v29  ;;  %v1172_v41 = vmul.f32 1.442695, %v1163_v34 }
 0x672   : > { %v1174_v35 = vmul.f32 1.442695, %v1164_v30 }
 0x673   : > { %v1149_v36 = vpop.xlane.xlu0 %1148 }
 0x674   : > { %2581 = vpow2.f32 %v1174_v35  ;;  %v1165_v37 = vsub.f32 %v1133_v24, %v1149_v36 }
 0x675   : > { %2583 = vpow2.f32 %v1170_v33  ;;  %v1155_v5 = vpop.xlane.xlu1 %1154 }
 0x676   : > { %v1176_v43 = vmul.f32 1.442695, %v1165_v37  ;;  %v1167_v8 = vsub.f32 %v3244_v15, %v1155_v5 }
 0x677   : > { %v1152_v44 = vpop.xlane.xlu0 %1151 }
 0x678   : > { %2585 = vpow2.f32 %v1176_v43  ;;  %v1166_v45 = vsub.f32 %v1134_v14, %v1152_v44  ;;  %v1180_v10 = vmul.f32 1.442695, %v1167_v8 }
 0x679   : > { %2587 = vpow2.f32 %v1172_v41  ;;  %v1161_v6 = vpop.xlane.xlu1 %1160 }
 0x67a   : > { %v1178_v48 = vmul.f32 1.442695, %v1166_v45  ;;  %v1169_v7 = vsub.f32 %v1137_v19, %v1161_v6 }
 0x67b   : > { %v1158_v46 = vpop.xlane.xlu0 %1157 }
 0x67c   : > { %v1168_v16 = vsub.f32 %v1136_v21, %v1158_v46  ;;  %v1184_v9 = vmul.f32 1.442695, %v1169_v7 }
 0x67e   : > { %v3252_v47 = vpop.eup %2581  ;;  %v1182_v49 = vmul.f32 1.442695, %v1168_v16 }
 0x67f   : > { %v1192_v51 = vsel %vm750_vm0, %v3252_v47, 0.0  ;;  %v2584_v23 = vpop.eup %2583 }
 0x680   : > { %2589 = vpow2.f32 %v1182_v49  ;;  %1193 = vadd.xlane.f32.xlu0 %v1192_v51  ;;  %v1186_v17 = vsel %vm750_vm0, %v2584_v23, 0.0  ;;  %v2511_v49 = vld [vmem:[#allocation5 + $0x6c] ss:$24 sps:$4 sm:$0xff]   ;;  %v2512_v51 = vld [vmem:[#allocation5 + $0x9c] ss:$24 sps:$4 sm:$0xff]  }
 0x681   : > { %2591 = vpow2.f32 %v1178_v48  ;;  %v2510_v48 = vld [vmem:[#allocation5 + $0x3c] ss:$24 sps:$4 sm:$0xff]  }
 0x682   : > { %v3256_v53 = vpop.eup %2585  ;;  %2593 = vpow2.f32 %v1184_v9 }
 0x683   : > { %v1195_v54 = vsel %vm750_vm0, %v3256_v53, 0.0  ;;  %v2588_v55 = vpop.eup %2587  ;;  %2595 = vpow2.f32 %v1180_v10 }
 0x684   : > { %1187 = vadd.xlane.f32.xlu0 %v1186_v17  ;;  %1196 = vadd.xlane.f32.xlu1 %v1195_v54  ;;  %v1189_v56 = vsel %vm750_vm0, %v2588_v55, 0.0  ;;  %v2515_v17 = vld [vmem:[#allocation5 + $0x12c] ss:$24 sps:$4 sm:$0xff]   ;;  %v2516_v54 = vld [vmem:[#allocation5 + $0x15c] ss:$24 sps:$4 sm:$0xff]  }
 0x688   : > { %1190 = vadd.xlane.f32.xlu1 %v1189_v56 }
 0x68a   : > { %v3262_v31 = vpop.eup %2589 }
 0x68b   : > { %v1204_v58 = vsel %vm750_vm0, %v3262_v31, 0.0  ;;  %v3266_v39 = vpop.eup %2591 }
 0x68c   : > { %1205 = vadd.xlane.f32.xlu0 %v1204_v58  ;;  %v1198_v3 = vsel %vm750_vm0, %v3266_v39, 0.0  ;;  %v2594_v42 = vpop.eup %2593 }
 0x68d   : > { %v1207_v24 = vsel %vm750_vm0, %v2594_v42, 0.0  ;;  %v2596_v11 = vpop.eup %2595 }
 0x690   : > { %1199 = vadd.xlane.f32.xlu0 %v1198_v3 }
 0x699   : > { %1236 = vrot.lane.b32.xlu1 %v3107_v26, %s2819_s18  ;;  %v1201_v26 = vsel %vm750_vm0, %v2596_v11, 0.0 }
 0x69d   : > { %1238 = vrot.lane.b32.xlu1 %v3129_v52, %s2819_s18 }
 0x6a6   : > { %1234 = vrot.lane.b32.xlu0 %v3109_v28, %s2819_s18 }
 0x6c1   : > { %1208 = vadd.xlane.f32.xlu1 %v1207_v24 }
 0x6c5   : > { %1202 = vadd.xlane.f32.xlu1 %v1201_v26 }
 0x6d6   : > { %1240 = vrot.lane.b32.xlu1 %v3126_v50, %s2819_s18 }
 0x70d   : > { %v1194_v28 = vpop.xlane.xlu0 %1193 }
 0x711   : > { %v1188_v52 = vpop.xlane.xlu0 %1187  ;;  %v1197_v13 = vpop.xlane.xlu1 %1196 }
 0x712   : > { %2597 = vrcp.f32 %v1188_v52 }
 0x715   : > { %v1191_v63 = vpop.xlane.xlu1 %1190 }
 0x716   : > { %2599 = vrcp.f32 %v1191_v63 }
 0x717   : > { %2601 = vrcp.f32 %v1197_v13 }
 0x718   : > { %2603 = vrcp.f32 %v1194_v28 }
 0x719   : > { %v1206_v57 = vpop.xlane.xlu0 %1205  ;;  %v1237_v18 = vpop.permute.xlu1 %1236 }
 0x71c   : > { %v2598_v14 = vpop.eup %2597 }
 0x71d   : > { %v1200_v12 = vpop.xlane.xlu0 %1199  ;;  %v1218_v20 = vmul.f32 %v2598_v14, %v2584_v23  ;;  %v1239_v50 = vpop.permute.xlu1 %1238  ;;  %v2513_v23 = vld [vmem:[#allocation5 + $0xcc] ss:$24 sps:$4 sm:$0xff]  }
 0x720   : > { %v2600_v15 = vpop.eup %2599 }
 0x721   : > { %v1235_v19 = vpop.permute.xlu0 %1234  ;;  %v1219_v21 = vmul.f32 %v2600_v15, %v2588_v55  ;;  %v2602_v25 = vpop.eup %2601 }
 0x722   : > { %2286 = vmatprep.subr.bf16.mxu1 %v1235_v19  ;;  %v2604_v2 = vpop.eup %2603  ;;  %v1221_v27 = vmul.f32 %v2602_v25, %v3256_v53  ;;  %v2514_v53 = vld [vmem:[#allocation5 + $0xfc] ss:$24 sps:$4 sm:$0xff]  }
 0x723   : > { %2287 = vmatpush3.bf16.msra.mxu1 %v1235_v19  ;;  %v1226_v40 = vpack.c.bf16 %v1219_v21, %v1218_v20  ;;  %v1220_v30 = vmul.f32 %v2604_v2, %v3252_v47  ;;  %v2509_v47 = vld [vmem:[#allocation5 + $0xc] ss:$24 sps:$4 sm:$0xff]  }
 0x724   : > { %2288 = vmatprep.subr.bf16.mxu1 %v1237_v18  ;;  %2302 = vmatprep.subr.bf16.mxu0 %v2509_v47 }
 0x725   : > { %2294 = vmatprep.mubr.msk.bf16.mxu1 %vm750_vm0, %v1226_v40  ;;  %v1227_v33 = vpack.c.bf16 %v1221_v27, %v1220_v30  ;;  %2303 = vmatpush3.bf16.msra.mxu0 %v2509_v47 }
 0x726   : > { %2304 = vmatprep.subr.bf16.mxu0 %v2510_v48 }
 0x727   : > { %2289 = vmatpush3.bf16.msra.mxu1 %v1237_v18 }
 0x728   : > { %2290 = vmatprep.subr.bf16.mxu1 %v1239_v50 }
 0x729   : > { %2305 = vmatpush3.bf16.msra.mxu0 %v2510_v48 }
 0x72a   : > { %2306 = vmatprep.subr.bf16.mxu0 %v2511_v49 }
 0x72b   : > { %2291 = vmatpush3.bf16.msra.mxu1 %v1239_v50 }
 0x72d   : > { %2307 = vmatpush3.bf16.msra.mxu0 %v2511_v49 }
 0x72e   : > { %2308 = vmatprep.subr.bf16.mxu0 %v2512_v51 }
 0x731   : > { %2309 = vmatpush3.bf16.msra.mxu0 %v2512_v51 }
 0x732   : > { %2310 = vmatprep.subr.bf16.mxu0 %v2513_v23 }
 0x735   : > { %2311 = vmatpush3.bf16.msra.mxu0 %v2513_v23  ;;  %v2649_v23 = vld [vmem:[%s3027_s28 + $0x28] sm:$0xff] }
 0x736   : > { %2312 = vmatprep.subr.bf16.mxu0 %v2514_v53 }
 0x739   : > { %2313 = vmatpush3.bf16.msra.mxu0 %v2514_v53 }
 0x73a   : > { %2314 = vmatprep.subr.bf16.mxu0 %v2515_v17 }
 0x73d   : > { %2315 = vmatpush3.bf16.msra.mxu0 %v2515_v17 }
 0x73e   : > { %2316 = vmatprep.subr.bf16.mxu0 %v2516_v54 }
 0x741   : > { %2317 = vmatpush3.bf16.msra.mxu0 %v2516_v54  ;;  %v2650_v54 = vld [vmem:[%s3027_s28 + $0x20] sm:$0xff] }
 0x74e   : > { %v1209_v22 = vpop.xlane.xlu1 %1208 }
 0x74f   : > { %2605 = vrcp.f32 %v1209_v22 }
 0x750   : > { %2607 = vrcp.f32 %v1200_v12 }
 0x751   : > { %2609 = vrcp.f32 %v1206_v57 }
 0x752   : > { %v1203_v38 = vpop.xlane.xlu1 %1202 }
 0x753   : > { %2611 = vrcp.f32 %v1203_v38  ;;  %v2098_v38 = vld [vmem:[#allocation7 + $0x5] ss:$0 sm:$0xff] }
 0x756   : > { %v1241_v29 = vpop.permute.xlu1 %1240 }
 0x757   : > { %2292 = vmatprep.subr.bf16.mxu1 %v1241_v29 }
 0x758   : > { %2293 = vmatpush3.bf16.msra.mxu1 %v1241_v29 }
 0x759   : > { %v2606_v34 = vpop.eup %2605 }
 0x75a   : > { %v2608_v35 = vpop.eup %2607  ;;  %v1225_v41 = vmul.f32 %v2606_v34, %v2594_v42 }
 0x75b   : > { %2295 = vmatmul.mubr.msk.bf16.vlgmr.msra.gmra.mrb[24].mxu1 %vm750_vm0, %v1227_v33  ;;  %v2610_v36 = vpop.eup %2609  ;;  %v1222_v43 = vmul.f32 %v2608_v35, %v3266_v39  ;;  %v2646_v35 = vld [vmem:[%s3027_s28 + $0x8] sm:$0xff] }
 0x75c   : > { %v1224_v45 = vmul.f32 %v2610_v36, %v3262_v31 }
 0x75d   : > { %v2612_v37 = vpop.eup %2611 }
 0x75e   : > { %v1223_v44 = vmul.f32 %v2612_v37, %v2596_v11  ;;  %v1229_v16 = vpack.c.bf16 %v1225_v41, %v1224_v45 }
 0x760   : > { %v1228_v46 = vpack.c.bf16 %v1223_v44, %v1222_v43 }
 0x762   : > { %2298 = vmatprep.mubr.msk.bf16.mxu1 %vm750_vm0, %v1228_v46 }
 0x763   : > { %2299 = vmatmul.mubr.msk.bf16.gmra.mrb[28].mxu1 %vm750_vm0, %v1229_v16  ;;  %v2648_v16 = vld [vmem:[%s3027_s28 + $0x18] sm:$0xff] }
 0x82e   : > { %v2296_v55 = vpop.f32.mrb[24].mxu1 }
 0x82f   : > { %v1292_v56 = vpop.f32.mrb[25].mxu1 }
 0x830   : > { %v2297_v31 = vpop.f32.mrb[26].mxu1 }
 0x831   : > { %v2462_v58 = vpack.i.bf16 %v2297_v31, %v2296_v55  ;;  %v1295_v39 = vpop.f32.mrb[27].mxu1 }
 0x832   : > { %v2457_v3 = vpack.i.bf16 %v1295_v39, %v1292_v56  ;;  %v2651_v56 = vld [vmem:[%s3027_s28 + $0x38] sm:$0xff] }
 0x833   : > { %2463 = vrot.lane.b32.xlu1 %v2462_v58, %s2819_s18  ;;  %v2652_v58 = vld [vmem:[%s3027_s28 + $0x30] sm:$0xff] }
 0x834   : > { %2458 = vrot.lane.b32.xlu0 %v2457_v3, %s2819_s18  ;;  %v2517_v3 = vld [vmem:[#allocation5 + $0x10] ss:$24 sps:$4 sm:$0xff]  }
 0x835   : > { %2326 = vmatprep.subr.bf16.mxu1 %v2517_v3 }
 0x836   : > { %v2300_v5 = vpop.f32.mrb[28].mxu1  ;;  %2327 = vmatpush3.bf16.msra.mxu1 %v2517_v3 }
 0x837   : > { %v1308_v6 = vpop.f32.mrb[29].mxu1 }
 0x838   : > { %v2301_v7 = vpop.f32.mrb[30].mxu1 }
 0x839   : > { %v2472_v8 = vpack.i.bf16 %v2301_v7, %v2300_v5  ;;  %v1311_v9 = vpop.f32.mrb[31].mxu1 }
 0x83a   : > { %v2467_v10 = vpack.i.bf16 %v1311_v9, %v1308_v6 }
 0x83b   : > { %2473 = vrot.lane.b32.xlu1 %v2472_v8, %s2819_s18 }
 0x83c   : > { %2468 = vrot.lane.b32.xlu0 %v2467_v10, %s2819_s18 }
 0x8a5   : > { %v2464_v42 = vpop.permute.xlu1 %2463 }
 0x8a6   : > { %v2466_v24 = vunpack.i.h.bf16 %v2464_v42  ;;  %v2465_v11 = vunpack.i.l.bf16 %v2464_v42  ;;  %v2459_v26 = vpop.permute.xlu0 %2458 }
 0x8a7   : > { %v2461_v28 = vunpack.i.h.bf16 %v2459_v26  ;;  %v2460_v52 = vunpack.i.l.bf16 %v2459_v26 }
 0x8a8   : > { %v1358_v13 = vsel %vm750_vm0, %v3229_v61, %v2466_v24  ;;  %v1357_v63 = vsel %vm750_vm0, %v3225_v59, %v2465_v11 }
 0x8a9   : > { %v1364_v57 = vpack.c.bf16 %v1358_v13, %v1357_v63  ;;  %v1355_v12 = vsel %vm750_vm0, %v3227_v60, %v2460_v52  ;;  %v1356_v14 = vsel %vm750_vm0, %v3231_v62, %v2461_v28 }
 0x8aa   : > { %v1363_v15 = vpack.c.bf16 %v1356_v14, %v1355_v12 }
 0x8ac   : > { %2318 = vmatprep.mubr.bf16.mxu0 %v1363_v15 }
 0x8ad   : > { %2319 = vmatmul.mubr.bf16.vlgmr.msra.gmra.mrb[24].mxu0 %v1364_v57  ;;  %v2474_v18 = vpop.permute.xlu1 %2473 }
 0x8ae   : > { %v2476_v19 = vunpack.i.h.bf16 %v2474_v18  ;;  %v2475_v20 = vunpack.i.l.bf16 %v2474_v18  ;;  %v2469_v21 = vpop.permute.xlu0 %2468 }
 0x8af   : > { %v2471_v40 = vunpack.i.h.bf16 %v2469_v21  ;;  %v2470_v50 = vunpack.i.l.bf16 %v2469_v21 }
 0x8b0   : > { %v1361_v59 = vsel %vm750_vm0, %v3233_v0, %v2475_v20  ;;  %v1362_v61 = vsel %vm750_vm0, %v3237_v1, %v2476_v19  ;;  %v2645_v1 = vld [vmem:[%s3027_s28] sm:$0xff] }
 0x8b1   : > { %v1359_v60 = vsel %vm750_vm0, %v3235_v32, %v2470_v50  ;;  %v1360_v62 = vsel %vm750_vm0, %v3239_v4, %v2471_v40  ;;  %v1366_v22 = vpack.c.bf16 %v1362_v61, %v1361_v59  ;;  %v2647_v4 = vld [vmem:[%s3027_s28 + $0x10] sm:$0xff] }
 0x8b2   : > { %v1365_v25 = vpack.c.bf16 %v1360_v62, %v1359_v60 }
 0x8b4   : > { %2322 = vmatprep.mubr.bf16.mxu0 %v1365_v25 }
 0x8b5   : > { %2323 = vmatmul.mubr.bf16.gmra.mrb[28].mxu0 %v1366_v22 }
 0x980   : > { %v2320_v2 = vpop.f32.mrb[24].mxu0 }
 0x981   : > { %v1453_v27 = vpop.f32.mrb[25].mxu0  ;;  %v1462_v33 = vadd.f32 %v2320_v2, %v2098_v38 }
 0x982   : > { %v1454_v29 = vadd.f32 %v2098_v38, %v1453_v27  ;;  %v2321_v0 = vpop.f32.mrb[26].mxu0  ;;  %v2518_v27 = vld [vmem:[#allocation5 + $0x40] ss:$24 sps:$4 sm:$0xff]  }
 0x983   : > { %v1456_v30 = vpop.f32.mrb[27].mxu0  ;;  %v3317_v37 = vadd.f32 %v2647_v4, %v1462_v33  ;;  %v1465_v41 = vadd.f32 %v2321_v0, %v2098_v38  ;;  %2328 = vmatprep.subr.bf16.mxu1 %v2518_v27  ;;  %v2520_v0 = vld [vmem:[#allocation5 + $0xa0] ss:$24 sps:$4 sm:$0xff]  }
 0x984   : > { %v3310_v34 = vadd.f32 %v2645_v1, %v1454_v29  ;;  %v1457_v32 = vadd.f32 %v2098_v38, %v1456_v30  ;;  %2329 = vmatpush3.bf16.msra.mxu1 %v2518_v27  ;;  %v2519_v29 = vld [vmem:[#allocation5 + $0x70] ss:$24 sps:$4 sm:$0xff]   ;;  %v2522_v33 = vld [vmem:[#allocation5 + $0x100] ss:$24 sps:$4 sm:$0xff]  }
 0x985   : > { %v3322_v47 = vadd.f32 %v2648_v16, %v1465_v41  ;;  %2330 = vmatprep.subr.bf16.mxu1 %v2519_v29  ;;  %v2521_v30 = vld [vmem:[#allocation5 + $0xd0] ss:$24 sps:$4 sm:$0xff]  }
 0x986   : > { %v3313_v36 = vadd.f32 %v2646_v35, %v1457_v32  ;;  %1492 = vadd.xlane.f32.xlu0 %v3310_v34  ;;  %v2523_v1 = vld [vmem:[#allocation5 + $0x130] ss:$24 sps:$4 sm:$0xff]   ;;  %v2524_v32 = vld [vmem:[#allocation5 + $0x160] ss:$24 sps:$4 sm:$0xff]  }
 0x988   : > { %1494 = vadd.xlane.f32.xlu1 %v3313_v36  ;;  %v2324_v43 = vpop.f32.mrb[28].mxu0  ;;  %2331 = vmatpush3.bf16.msra.mxu1 %v2519_v29 }
 0x989   : > { %v1469_v44 = vpop.f32.mrb[29].mxu0  ;;  %v1478_v17 = vadd.f32 %v2324_v43, %v2098_v38  ;;  %2332 = vmatprep.subr.bf16.mxu1 %v2520_v0 }
 0x98a   : > { %1496 = vadd.xlane.f32.xlu0 %v3317_v37  ;;  %v2325_v45 = vpop.f32.mrb[30].mxu0  ;;  %v1470_v48 = vadd.f32 %v2098_v38, %v1469_v44 }
 0x98b   : > { %v1472_v46 = vpop.f32.mrb[31].mxu0  ;;  %v1481_v51 = vadd.f32 %v2325_v45, %v2098_v38  ;;  %v3337_v39 = vadd.f32 %v2652_v58, %v1478_v17 }
 0x98c   : > { %v1473_v49 = vadd.f32 %v2098_v38, %v1472_v46  ;;  %v3329_v55 = vadd.f32 %v2650_v54, %v1470_v48  ;;  %2333 = vmatpush3.bf16.msra.mxu1 %v2520_v0 }
 0x98d   : > { %v3333_v31 = vadd.f32 %v2651_v56, %v1481_v51  ;;  %2334 = vmatprep.subr.bf16.mxu1 %v2521_v30 }
 0x98e   : > { %v3325_v53 = vadd.f32 %v2649_v23, %v1473_v49  ;;  %1498 = vadd.xlane.f32.xlu0 %v3322_v47 }
 0x990   : > { %1502 = vadd.xlane.f32.xlu1 %v3325_v53  ;;  %2335 = vmatpush3.bf16.msra.mxu1 %v2521_v30 }
 0x991   : > { %2336 = vmatprep.subr.bf16.mxu1 %v2522_v33 }
 0x992   : > { %1500 = vadd.xlane.f32.xlu0 %v3329_v55 }
 0x994   : > { %1506 = vadd.xlane.f32.xlu1 %v3333_v31  ;;  %2337 = vmatpush3.bf16.msra.mxu1 %v2522_v33 }
 0x995   : > { %2338 = vmatprep.subr.bf16.mxu1 %v2523_v1 }
 0x996   : > { %1504 = vadd.xlane.f32.xlu0 %v3337_v39 }
 0x998   : > { %2339 = vmatpush3.bf16.msra.mxu1 %v2523_v1 }
 0x999   : > { %2340 = vmatprep.subr.bf16.mxu1 %v2524_v32 }
 0x99c   : > { %2341 = vmatpush3.bf16.msra.mxu1 %v2524_v32 }
 0xa13   : > { %v1493_v5 = vpop.xlane.xlu0 %1492 }
 0xa14   : > { %v1508_v6 = vmul.f32 0.0078125, %v1493_v5  ;;  %v2107_v5 = vld [vmem:[#allocation7 + $0x6] ss:$0 sm:$0xff] }
 0xa15   : > { %v1495_v7 = vpop.xlane.xlu1 %1494 }
 0xa16   : > { %v3342_v8 = vsub.f32 %v3310_v34, %v1508_v6  ;;  %v1509_v9 = vmul.f32 0.0078125, %v1495_v7 }
 0xa17   : > { %v1497_v10 = vpop.xlane.xlu0 %1496 }
 0xa18   : > { %v3345_v42 = vsub.f32 %v3313_v36, %v1509_v9  ;;  %v1510_v24 = vmul.f32 0.0078125, %v1497_v10  ;;  %v1524_v11 = vmul.f32 %v3342_v8, %v3342_v8 }
 0xa1a   : > { %v3350_v26 = vsub.f32 %v3317_v37, %v1510_v24  ;;  %1532 = vadd.xlane.f32.xlu0 %v1524_v11  ;;  %v1525_v28 = vmul.f32 %v3345_v42, %v3345_v42 }
 0xa1b   : > { %v1499_v52 = vpop.xlane.xlu0 %1498 }
 0xa1c   : > { %v1511_v13 = vmul.f32 0.0078125, %v1499_v52  ;;  %1534 = vadd.xlane.f32.xlu1 %v1525_v28  ;;  %v1526_v63 = vmul.f32 %v3350_v26, %v3350_v26 }
 0xa1d   : > { %v1503_v57 = vpop.xlane.xlu1 %1502 }
 0xa1e   : > { %v3357_v12 = vsub.f32 %v3322_v47, %v1511_v13  ;;  %v1513_v14 = vmul.f32 0.0078125, %v1503_v57  ;;  %1536 = vadd.xlane.f32.xlu0 %v1526_v63 }
 0xa1f   : > { %v1501_v15 = vpop.xlane.xlu0 %1500 }
 0xa20   : > { %v3360_v18 = vsub.f32 %v3325_v53, %v1513_v14  ;;  %v1512_v19 = vmul.f32 0.0078125, %v1501_v15  ;;  %v1527_v20 = vmul.f32 %v3357_v12, %v3357_v12 }
 0xa21   : > { %v1507_v21 = vpop.xlane.xlu1 %1506 }
 0xa22   : > { %v3365_v40 = vsub.f32 %v3329_v55, %v1512_v19  ;;  %v1515_v50 = vmul.f32 0.0078125, %v1507_v21  ;;  %1538 = vadd.xlane.f32.xlu1 %v1527_v20  ;;  %v1529_v62 = vmul.f32 %v3360_v18, %v3360_v18  ;;  %v2108_v19 = vld [vmem:[#allocation7 + $0x7] ss:$0 sm:$0xff] }
 0xa23   : > { %v1505_v59 = vpop.xlane.xlu0 %1504 }
 0xa24   : > { %v3368_v61 = vsub.f32 %v3333_v31, %v1515_v50  ;;  %v1514_v60 = vmul.f32 0.0078125, %v1505_v59  ;;  %v1528_v22 = vmul.f32 %v3365_v40, %v3365_v40 }
 0xa26   : > { %v3375_v25 = vsub.f32 %v3337_v39, %v1514_v60  ;;  %1542 = vadd.xlane.f32.xlu1 %v1529_v62  ;;  %1540 = vadd.xlane.f32.xlu0 %v1528_v22  ;;  %v1531_v38 = vmul.f32 %v3368_v61, %v3368_v61 }
 0xa28   : > { %v1530_v2 = vmul.f32 %v3375_v25, %v3375_v25 }
 0xa2a   : > { %1546 = vadd.xlane.f32.xlu1 %v1531_v38  ;;  %1544 = vadd.xlane.f32.xlu0 %v1530_v2 }
 0xaa7   : > { %v1533_v35 = vpop.xlane.xlu0 %1532 }
 0xaa8   : > { %v1548_v4 = vmul.f32 0.0078125, %v1533_v35 }
 0xaa9   : > { %v1535_v41 = vpop.xlane.xlu1 %1534 }
 0xaaa   : > { %v1556_v43 = vadd.f32 1e-05, %v1548_v4  ;;  %v1549_v44 = vmul.f32 0.0078125, %v1535_v41 }
 0xaab   : > { %v1537_v45 = vpop.xlane.xlu0 %1536 }
 0xaac   : > { %2613 = vrsqrt.f32 %v1556_v43  ;;  %v1557_v46 = vadd.f32 1e-05, %v1549_v44  ;;  %v1550_v16 = vmul.f32 0.0078125, %v1537_v45 }
 0xaae   : > { %2615 = vrsqrt.f32 %v1557_v46  ;;  %v1558_v48 = vadd.f32 1e-05, %v1550_v16 }
 0xaaf   : > { %v1539_v49 = vpop.xlane.xlu1 %1538 }
 0xab0   : > { %2617 = vrsqrt.f32 %v1558_v48  ;;  %v1551_v51 = vmul.f32 0.0078125, %v1539_v49  ;;  %v2526_v49 = vld [vmem:[#allocation5 + $0x44] ss:$24 sps:$4 sm:$0xff]  }
 0xab2   : > { %v1559_v23 = vadd.f32 1e-05, %v1551_v51  ;;  %v2527_v51 = vld [vmem:[#allocation5 + $0x74] ss:$24 sps:$4 sm:$0xff]  }
 0xab3   : > { %v1543_v17 = vpop.xlane.xlu1 %1542  ;;  %v1541_v54 = vpop.xlane.xlu0 %1540 }
 0xab4   : > { %2619 = vrsqrt.f32 %v1559_v23  ;;  %v1553_v56 = vmul.f32 0.0078125, %v1543_v17  ;;  %v1552_v58 = vmul.f32 0.0078125, %v1541_v54  ;;  %v2530_v23 = vld [vmem:[#allocation5 + $0x104] ss:$24 sps:$4 sm:$0xff]   ;;  %v2531_v17 = vld [vmem:[#allocation5 + $0x134] ss:$24 sps:$4 sm:$0xff]  }
 0xab5   : > { %v2532_v54 = vld [vmem:[#allocation5 + $0x164] ss:$24 sps:$4 sm:$0xff]  }
 0xab6   : > { %v2614_v3 = vpop.eup %2613  ;;  %v1561_v6 = vadd.f32 1e-05, %v1553_v56  ;;  %v1560_v7 = vadd.f32 1e-05, %v1552_v58  ;;  %v2109_v56 = vld [vmem:[#allocation7 + $0x8] ss:$0 sm:$0xff] }
 0xab7   : > { %v1547_v9 = vpop.xlane.xlu1 %1546  ;;  %v1545_v10 = vpop.xlane.xlu0 %1544  ;;  %v1572_v24 = vmul.f32 %v2614_v3, %v3342_v8 }
 0xab8   : > { %v2616_v11 = vpop.eup %2615  ;;  %2621 = vrsqrt.f32 %v1561_v6  ;;  %v1555_v28 = vmul.f32 0.0078125, %v1547_v9  ;;  %v1554_v52 = vmul.f32 0.0078125, %v1545_v10 }
 0xab9   : > { %2623 = vrsqrt.f32 %v1560_v7  ;;  %v1573_v13 = vmul.f32 %v2616_v11, %v3345_v42  ;;  %v1584_v63 = vmul.f32 %v2107_v5, %v1572_v24 }
 0xaba   : > { %v2618_v57 = vpop.eup %2617  ;;  %v1563_v14 = vadd.f32 1e-05, %v1555_v28  ;;  %v1562_v15 = vadd.f32 1e-05, %v1554_v52 }
 0xabb   : > { %v1574_v20 = vmul.f32 %v2618_v57, %v3350_v26  ;;  %v1585_v21 = vmul.f32 %v2107_v5, %v1573_v13  ;;  %v1596_v50 = vadd.f32 %v2108_v19, %v1584_v63 }
 0xabc   : > { %2625 = vrsqrt.f32 %v1563_v14 }
 0xabd   : > { %2627 = vrsqrt.f32 %v1562_v15  ;;  %v1597_v59 = vadd.f32 %v2108_v19, %v1585_v21  ;;  %v1586_v60 = vmul.f32 %v2107_v5, %v1574_v20 }
 0xabe   : > { %v2620_v8 = vpop.eup %2619 }
 0xabf   : > { %v1575_v62 = vmul.f32 %v2620_v8, %v3357_v12  ;;  %v1604_v22 = vpack.c.bf16 %v1597_v59, %v1596_v50  ;;  %v1598_v27 = vadd.f32 %v2108_v19, %v1586_v60 }
 0xac1   : > { %v1587_v38 = vmul.f32 %v2107_v5, %v1575_v62  ;;  %2342 = vmatprep.mubr.bf16.mxu1 %v1604_v22 }
 0xac2   : > { %v2622_v42 = vpop.eup %2621 }
 0xac3   : > { %v2624_v2 = vpop.eup %2623  ;;  %v1599_v29 = vadd.f32 %v2108_v19, %v1587_v38  ;;  %v1577_v0 = vmul.f32 %v2622_v42, %v3360_v18 }
 0xac4   : > { %v1576_v26 = vmul.f32 %v2624_v2, %v3365_v40  ;;  %v2525_v40 = vld [vmem:[#allocation5 + $0x14] ss:$24 sps:$4 sm:$0xff]  }
 0xac5   : > { %v1605_v30 = vpack.c.bf16 %v1599_v29, %v1598_v27  ;;  %v1589_v33 = vmul.f32 %v2107_v5, %v1577_v0  ;;  %2350 = vmatprep.subr.bf16.mxu0 %v2525_v40 }
 0xac6   : > { %v2626_v1 = vpop.eup %2625  ;;  %v1588_v32 = vmul.f32 %v2107_v5, %v1576_v26  ;;  %2351 = vmatpush3.bf16.msra.mxu0 %v2525_v40 }
 0xac7   : > { %v2628_v35 = vpop.eup %2627  ;;  %2343 = vmatmul.mubr.bf16.vlgmr.msra.gmra.mrb[32].mxu1 %v1605_v30  ;;  %v1601_v4 = vadd.f32 %v2108_v19, %v1589_v33  ;;  %v1579_v12 = vmul.f32 %v2626_v1, %v3368_v61  ;;  %2352 = vmatprep.subr.bf16.mxu0 %v2526_v49  ;;  %v2528_v61 = vld [vmem:[#allocation5 + $0xa4] ss:$24 sps:$4 sm:$0xff]  }
 0xac8   : > { %v1600_v41 = vadd.f32 %v2108_v19, %v1588_v32  ;;  %v1578_v43 = vmul.f32 %v2628_v35, %v3375_v25  ;;  %v2529_v25 = vld [vmem:[#allocation5 + $0xd4] ss:$24 sps:$4 sm:$0xff]  }
 0xac9   : > { %v1591_v44 = vmul.f32 %v2107_v5, %v1579_v12 }
 0xaca   : > { %v1606_v45 = vpack.c.bf16 %v1601_v4, %v1600_v41  ;;  %v1590_v46 = vmul.f32 %v2107_v5, %v1578_v43  ;;  %2353 = vmatpush3.bf16.msra.mxu0 %v2526_v49 }
 0xacb   : > { %v1603_v16 = vadd.f32 %v2108_v19, %v1591_v44  ;;  %2354 = vmatprep.subr.bf16.mxu0 %v2527_v51 }
 0xacc   : > { %2346 = vmatprep.mubr.bf16.mxu1 %v1606_v45  ;;  %v1602_v18 = vadd.f32 %v2108_v19, %v1590_v46 }
 0xace   : > { %v1607_v48 = vpack.c.bf16 %v1603_v16, %v1602_v18  ;;  %2355 = vmatpush3.bf16.msra.mxu0 %v2527_v51 }
 0xacf   : > { %2356 = vmatprep.subr.bf16.mxu0 %v2528_v61 }
 0xad0   : > { %2347 = vmatmul.mubr.bf16.gmra.mrb[36].mxu1 %v1607_v48 }
 0xad2   : > { %2357 = vmatpush3.bf16.msra.mxu0 %v2528_v61 }
 0xad3   : > { %2358 = vmatprep.subr.bf16.mxu0 %v2529_v25 }
 0xad6   : > { %2359 = vmatpush3.bf16.msra.mxu0 %v2529_v25 }
 0xad7   : > { %2360 = vmatprep.subr.bf16.mxu0 %v2530_v23 }
 0xada   : > { %2361 = vmatpush3.bf16.msra.mxu0 %v2530_v23 }
 0xadb   : > { %2362 = vmatprep.subr.bf16.mxu0 %v2531_v17 }
 0xade   : > { %2363 = vmatpush3.bf16.msra.mxu0 %v2531_v17 }
 0xadf   : > { %2364 = vmatprep.subr.bf16.mxu0 %v2532_v54 }
 0xae2   : > { %2365 = vmatpush3.bf16.msra.mxu0 %v2532_v54 }
 0xb9a   : > { %v2344_v58 = vpop.f32.mrb[32].mxu1 }
 0xb9b   : > { %v3389_v3 = vadd.f32 %v2344_v58, %v2109_v56  ;;  %v1694_v5 = vpop.f32.mrb[33].mxu1 }
 0xb9c   : > { %v3391_v6 = vadd.f32 %v2109_v56, %v1694_v5  ;;  %v2345_v7 = vpop.f32.mrb[34].mxu1 }
 0xb9d   : > { %v1735_v9 = vmul.f32 %v3389_v3, %v3389_v3  ;;  %v3395_v10 = vadd.f32 %v2345_v7, %v2109_v56  ;;  %v1697_v24 = vpop.f32.mrb[35].mxu1 }
 0xb9e   : > { %v1733_v11 = vmul.f32 %v3391_v6, %v3391_v6  ;;  %v3399_v28 = vadd.f32 %v2109_v56, %v1697_v24 }
 0xb9f   : > { %v1743_v52 = vmul.f32 %v1735_v9, %v3389_v3  ;;  %v1736_v13 = vmul.f32 %v3395_v10, %v3395_v10 }
 0xba0   : > { %v1741_v63 = vmul.f32 %v1733_v11, %v3391_v6  ;;  %v1734_v57 = vmul.f32 %v3399_v28, %v3399_v28 }
 0xba1   : > { %v1751_v14 = vmul.f32 0.044715, %v1743_v52  ;;  %v1744_v15 = vmul.f32 %v1736_v13, %v3395_v10  ;;  %v1727_v52 = vmul.f32 0.5, %v3389_v3  ;;  %v1728_v13 = vmul.f32 0.5, %v3395_v10 }
 0xba2   : > { %v1749_v19 = vmul.f32 0.044715, %v1741_v63  ;;  %v1742_v20 = vmul.f32 %v1734_v57, %v3399_v28  ;;  %v1725_v57 = vmul.f32 0.5, %v3391_v6 }
 0xba3   : > { %v1759_v21 = vadd.f32 %v1751_v14, %v3389_v3  ;;  %v1752_v50 = vmul.f32 0.044715, %v1744_v15  ;;  %v2348_v59 = vpop.f32.mrb[36].mxu1  ;;  %v1726_v14 = vmul.f32 0.5, %v3399_v28 }
 0xba4   : > { %v1757_v8 = vadd.f32 %v1749_v19, %v3391_v6  ;;  %v1750_v60 = vmul.f32 0.044715, %v1742_v20  ;;  %v3411_v62 = vadd.f32 %v2348_v59, %v2109_v56  ;;  %v1710_v22 = vpop.f32.mrb[37].mxu1 }
 0xba5   : > { %v1767_v38 = vmul.f32 0.7978846, %v1759_v21  ;;  %v1760_v42 = vadd.f32 %v1752_v50, %v3395_v10  ;;  %v3414_v2 = vadd.f32 %v2109_v56, %v1710_v22  ;;  %v2349_v27 = vpop.f32.mrb[38].mxu1 }
 0xba6   : > { %v1765_v29 = vmul.f32 0.7978846, %v1757_v8  ;;  %v1758_v0 = vadd.f32 %v1750_v60, %v3399_v28  ;;  %v1739_v26 = vmul.f32 %v3411_v62, %v3411_v62  ;;  %v1722_v30 = vadd.f32 %v2349_v27, %v2109_v56  ;;  %v1713_v33 = vpop.f32.mrb[39].mxu1 }
 0xba7   : > { %2629 = vtanh.f32 %v1767_v38  ;;  %v1768_v1 = vmul.f32 0.7978846, %v1760_v42  ;;  %v1737_v32 = vmul.f32 %v3414_v2, %v3414_v2  ;;  %v1714_v35 = vadd.f32 %v2109_v56, %v1713_v33 }
 0xba8   : > { %2631 = vtanh.f32 %v1765_v29  ;;  %v1766_v4 = vmul.f32 0.7978846, %v1758_v0  ;;  %v1747_v12 = vmul.f32 %v1739_v26, %v3411_v62  ;;  %v1740_v41 = vmul.f32 %v1722_v30, %v1722_v30 }
 0xba9   : > { %2633 = vtanh.f32 %v1768_v1  ;;  %v1745_v43 = vmul.f32 %v1737_v32, %v3414_v2  ;;  %v1738_v44 = vmul.f32 %v1714_v35, %v1714_v35  ;;  %v1731_v27 = vmul.f32 0.5, %v3411_v62 }
 0xbaa   : > { %2635 = vtanh.f32 %v1766_v4  ;;  %v1755_v45 = vmul.f32 0.044715, %v1747_v12  ;;  %v1748_v46 = vmul.f32 %v1740_v41, %v1722_v30  ;;  %v1732_v6 = vmul.f32 0.5, %v1722_v30 }
 0xbab   : > { %v1753_v16 = vmul.f32 0.044715, %v1745_v43  ;;  %v1746_v18 = vmul.f32 %v1738_v44, %v1714_v35  ;;  %v1729_v28 = vmul.f32 0.5, %v3414_v2  ;;  %v1730_v0 = vmul.f32 0.5, %v1714_v35  ;;  %v2118_v43 = vld [vmem:[#allocation7 + $0x9] ss:$0 sm:$0xff] }
 0xbac   : > { %v1763_v48 = vadd.f32 %v1755_v45, %v3411_v62  ;;  %v1756_v40 = vmul.f32 0.044715, %v1748_v46 }
 0xbad   : > { %v1761_v49 = vadd.f32 %v1753_v16, %v3414_v2  ;;  %v1754_v51 = vmul.f32 0.044715, %v1746_v18 }
 0xbae   : > { %v1771_v61 = vmul.f32 0.7978846, %v1763_v48  ;;  %v1764_v25 = vadd.f32 %v1756_v40, %v1722_v30 }
 0xbaf   : > { %v1769_v23 = vmul.f32 0.7978846, %v1761_v49  ;;  %v1762_v17 = vadd.f32 %v1754_v51, %v1714_v35 }
 0xbb0   : > { %2637 = vtanh.f32 %v1771_v61  ;;  %v1772_v54 = vmul.f32 0.7978846, %v1764_v25 }
 0xbb1   : > { %v2630_v56 = vpop.eup %2629  ;;  %2639 = vtanh.f32 %v1769_v23  ;;  %v1770_v58 = vmul.f32 0.7978846, %v1762_v17 }
 0xbb2   : > { %v2632_v5 = vpop.eup %2631  ;;  %v1783_v7 = vadd.f32 1.0, %v2630_v56  ;;  %2641 = vtanh.f32 %v1772_v54 }
 0xbb3   : > { %v2634_v9 = vpop.eup %2633  ;;  %2643 = vtanh.f32 %v1770_v58  ;;  %v1781_v24 = vadd.f32 1.0, %v2632_v5 }
 0xbb4   : > { %v2636_v11 = vpop.eup %2635  ;;  %v1784_v63 = vadd.f32 1.0, %v2634_v9  ;;  %v1791_v19 = vmul.f32 %v1783_v7, %v1727_v52 }
 0xbb5   : > { %v1782_v15 = vadd.f32 1.0, %v2636_v11  ;;  %v1789_v21 = vmul.f32 %v1781_v24, %v1725_v57 }
 0xbb6   : > { %v1792_v20 = vmul.f32 %v1784_v63, %v1728_v13 }
 0xbb7   : > { %v1790_v50 = vmul.f32 %v1782_v15, %v1726_v14 }
 0xbb8   : > { %v1798_v59 = vpack.c.bf16 %v1792_v20, %v1791_v19 }
 0xbb9   : > { %v1797_v8 = vpack.c.bf16 %v1790_v50, %v1789_v21 }
 0xbba   : > { %v2638_v60 = vpop.eup %2637 }
 0xbbb   : > { %v2640_v22 = vpop.eup %2639  ;;  %2366 = vmatprep.mubr.bf16.mxu0 %v1797_v8  ;;  %v1787_v38 = vadd.f32 1.0, %v2638_v60 }
 0xbbc   : > { %v2642_v42 = vpop.eup %2641  ;;  %2367 = vmatmul.mubr.bf16.vlgmr.msra.gmra.mrb[32].mxu0 %v1798_v59  ;;  %v1785_v3 = vadd.f32 1.0, %v2640_v22 }
 0xbbd   : > { %v2644_v10 = vpop.eup %2643  ;;  %v1788_v29 = vadd.f32 1.0, %v2642_v42  ;;  %v1795_v33 = vmul.f32 %v1787_v38, %v1731_v27 }
 0xbbe   : > { %v1786_v26 = vadd.f32 1.0, %v2644_v10  ;;  %v1793_v32 = vmul.f32 %v1785_v3, %v1729_v28 }
 0xbbf   : > { %v1796_v1 = vmul.f32 %v1788_v29, %v1732_v6 }
 0xbc0   : > { %v1794_v4 = vmul.f32 %v1786_v26, %v1730_v0 }
 0xbc1   : > { %v1800_v12 = vpack.c.bf16 %v1796_v1, %v1795_v33 }
 0xbc2   : > { %v1799_v41 = vpack.c.bf16 %v1794_v4, %v1793_v32 }
 0xbc4   : > { %2370 = vmatprep.mubr.bf16.mxu0 %v1799_v41 }
 0xbc5   : > { %2371 = vmatmul.mubr.bf16.gmra.mrb[36].mxu0 %v1800_v12 }
 0xc8f   : > { %v2368_v44 = vpop.f32.mrb[32].mxu0 }
 0xc90   : > { %v1896_v45 = vadd.f32 %v2368_v44, %v2118_v43  ;;  %v1887_v46 = vpop.f32.mrb[33].mxu0 }
 0xc91   : > { %v1888_v62 = vadd.f32 %v2118_v43, %v1887_v46  ;;  %v2369_v30 = vpop.f32.mrb[34].mxu0 }
 0xc92   : > { %v1920_v16 = vadd.f32 %v1896_v45, %v3317_v37  ;;  %v1899_v2 = vadd.f32 %v2369_v30, %v2118_v43  ;;  %v1890_v35 = vpop.f32.mrb[35].mxu0 }
 0xc93   : > { %v1918_v18 = vadd.f32 %v1888_v62, %v3310_v34  ;;  %v1891_v48 = vadd.f32 %v2118_v43, %v1890_v35 }
 0xc94   : > { %1928 = vst [vmem:[%s217_s20 + $0x10] sm:$0xff] %v1920_v16  ;;  %v1921_v40 = vadd.f32 %v1899_v2, %v3322_v47 }
 0xc95   : > { %1926 = vst [vmem:[%s217_s20] sm:$0xff] %v1918_v18  ;;  %v1919_v49 = vadd.f32 %v1891_v48, %v3313_v36 }
 0xc96   : > { %1929 = vst [vmem:[%s217_s20 + $0x18] sm:$0xff] %v1921_v40 }
 0xc97   : > { %1927 = vst [vmem:[%s217_s20 + $0x8] sm:$0xff] %v1919_v49 }
 0xc98   : > { %v2372_v51 = vpop.f32.mrb[36].mxu0 }
 0xc99   : > { %v1912_v61 = vadd.f32 %v2372_v51, %v2118_v43  ;;  %v1903_v37 = vpop.f32.mrb[37].mxu0 }
 0xc9a   : > { %v1904_v25 = vadd.f32 %v2118_v43, %v1903_v37  ;;  %v2373_v23 = vpop.f32.mrb[38].mxu0 }
 0xc9b   : > { %v1924_v34 = vadd.f32 %v1912_v61, %v3337_v39  ;;  %v1915_v17 = vadd.f32 %v2373_v23, %v2118_v43  ;;  %v1906_v54 = vpop.f32.mrb[39].mxu0 }
 0xc9c   : > { %v1922_v36 = vadd.f32 %v1904_v25, %v3329_v55  ;;  %v1907_v47 = vadd.f32 %v2118_v43, %v1906_v54 }
 0xc9d   : > { %1932 = vst [vmem:[%s217_s20 + $0x30] sm:$0xff] %v1924_v34  ;;  %v1925_v56 = vadd.f32 %v1915_v17, %v3333_v31 }
 0xc9e   : > { %1930 = vst [vmem:[%s217_s20 + $0x20] sm:$0xff] %v1922_v36  ;;  %v1923_v39 = vadd.f32 %v1907_v47, %v3325_v53 }
 0xc9f   : > { %1933 = vst [vmem:[%s217_s20 + $0x38] sm:$0xff] %v1925_v56 }
 0xca0   : > { %1931 = vst [vmem:[%s217_s20 + $0x28] sm:$0xff] %v1923_v39 }
 0xca1   : > { %2752 = shalt.err (!%p2749_p2)
}
 0xca2   : > { %s2753_s17 = scalar_lea.hbm %s3446_s16, 1024  ;;  %s2757_s5 = scalar_lea.hbm %s3494_s3, 2048 }
 0xca3   : > { %p2754_p13 = scmp.ne.s32.totalorder %s3446_s16, %s2753_s17  ;;  %p2758_p4 = scmp.lt.u32.totalorder %s3446_s16, %s3494_s3 }
 0xca4   : > { %p2759_p7 = scmp.lt.u32.totalorder %s2757_s5, %s2753_s17  ;;  %p2761_p11 = scmp.lt.u32.totalorder %s2753_s17, %s3446_s16 }
 0xca5   : > { %p2755_p6 = pnand %p2754_p13, %p3508_p0 }
 0xca6   : > { %p2760_p8 = por %p2759_p7, %p2758_p4 }
 0xca7   : > { %p2756_p10 = pneg %p2755_p6 }
 0xca8   : > { %p2762_p1 = por %p2761_p11, %p2760_p8 }
 0xcaa   : > { %p2763_p3 = pnand %p2762_p1, %p2756_p10 }
 0xcac   : > { %2766 = shalt.err (!%p2763_p3)
}
 0xcad   : > { %s2821_s18 = smov 128   ;;  %s2822_s20 = smov 8  }
 0xcae   : > { %2392 = dma.vmem_to_hbm [thread:$0]  (%p3508_p0), %s3439_s29, 1024, %s3446_s16, %s1935_s22, %s2821_s18, %s2821_s18, %s2822_s20  }
 0xcaf PF: > { %s1963_s30 = sand.u32 1, %s2797_s12   ;;  %p3509_p5 = scmp.ne.s32.totalorder %s3499_s19, 0 }
 0xcb0   : > { %p3510_p9 = scmp.ge.s32.totalorder %s2809_s15, 2  ;;  %s1964_s24 = scalar_lea.sflag [#allocation4], %s1963_s30 }
 0xcb2   : > { %p2406_p12 = pnand %p3510_p9, %p3509_p5 }
 0xcb4   : > { %2792 = dma.done.wait (!%p2406_p12), %s1964_s24, 1024  }
 0xcb5   : > { %2794 = vsyncadd (!%p2406_p12), %s1964_s24, 4294966272  ;;  %p17_p2 = scmp.ge.s32.totalorder %s2956_s6, 4   ;;  %s3511_s12 = smov %s2801_s13 }
 0xcb6   : > { %s3512_s13 = smov %s2805_s14  ;;  %s3513_s14 = smov %s2965_s9 }
 0xcb7   : > { %s3514_s15 = smov %s2956_s6  ;;  %19 = sbr.rel (!%p17_p2) target bundleno = 6 (0x6), region = 85 }
 0xcbe   :  { %1969 = vsyncpa [#allocation3], 1 }
 0xcbf   :  { %1971 = vsyncpa [#allocation3 + $0x1], 1 }
 0xcc0   :  { %1972 = vsyncpa [#allocation6], 1 }
 0xcc1   :  { %1973 = vsyncpa [#allocation4], 1 }
 0xcc2   :  { %1975 = vsyncpa [#allocation4 + $0x1], 1 }

</bundles_post_ra>
